<compile_context>
chip_gen: v5e
topology: v5e:2x2
jax: 0.10.0
libtpu: 0.0.40
codegen_flags: <defaults>
</compile_context>

<pallas_src>
import jax
import jax.numpy as jnp
import numpy as np
from jax import lax
from jax.experimental import pallas as pl
from jax.experimental.pallas import tpu as pltpu

# ---- model hyper-parameters (PyTorch module defaults, small shapes) ----
B = 4              # batch
HID = 30           # hidden_dim (nn.Linear(3, 30) -> ReLU -> nn.Linear(30, 3))
K_STEPS = 4        # number of integration steps k
DT = 0.1
G = 1.0            # solver g (module default)
L = 1.0            # solver l (module default)
HALF_PI = float(np.pi / 2.0)

_VMEM = pl.BlockSpec(memory_space=pltpu.MemorySpace.VMEM)

# Parameter-slab row layout (one [8, HID] f32 array, one vreg worth of data):
#   rows 0..2 : W1^T          (Linear(3,HID).weight transposed; row i = input-i weights)
#   row  3    : b1
#   rows 4..6 : W2            (Linear(HID,3).weight; row j = output-j weights)
#   row  7    : [b2_x, b2_y, b2_td, 0, ...]


# ----------------------------------------------------------------------------
# Fused kernel: k symplectic-Euler pendulum steps, each followed by the
# residual correction MLP.  Everything stays in VMEM / vregs.
# ----------------------------------------------------------------------------
def _make_hybrid_dynamics_kernel(k_steps: int):
    def kernel(z_ref, p_ref, out_ref):
        batch = z_ref.shape[0]

        p = p_ref[...]                                           # [8, HID] parameter slab
        # Hoisted, pre-broadcast parameter rows (kept OUT of the unrolled loop so the
        # sublane broadcasts are emitted once, not k times).
        w1_x  = jnp.broadcast_to(p[0:1, :], (batch, HID))        # Linear(3,H) col for x
        w1_y  = jnp.broadcast_to(p[1:2, :], (batch, HID))
        w1_td = jnp.broadcast_to(p[2:3, :], (batch, HID))
        b1    = jnp.broadcast_to(p[3:4, :], (batch, HID))
        w2_x  = jnp.broadcast_to(p[4:5, :], (batch, HID))        # Linear(H,3) row for x out
        w2_y  = jnp.broadcast_to(p[5:6, :], (batch, HID))
        w2_td = jnp.broadcast_to(p[6:7, :], (batch, HID))
        b2_x  = jnp.broadcast_to(p[7:8, 0:1], (batch, 1))
        b2_y  = jnp.broadcast_to(p[7:8, 1:2], (batch, 1))
        b2_td = jnp.broadcast_to(p[7:8, 2:3], (batch, 1))

        z0 = z_ref[...]                                          # [B, 3]
        x  = z0[:, 0:1]                                          # [B, 1]
        y  = z0[:, 1:2]
        td = z0[:, 2:3]

        # k is tiny and static -> fully unrolled trace (no control-flow lowering risk)
        for _ in range(k_steps):
            # --- theta = atan2(y, x) via unit-vector normalization (exact identity) ---
            # NOTE: the 1e-30 floor only matters for 0 < r^2 < 1e-30 (state is ~unit circle
            # in practice); atan2(0, 0) = 0 is handled exactly by the `where`.
            r2 = x * x + y * y
            inv_r = lax.rsqrt(jnp.maximum(r2, 1e-30))
            nz = r2 > 0.0
            c = jnp.where(nz, x * inv_r, 1.0)                    # cos(atan2(y, x))
            s = jnp.where(nz, y * inv_r, 0.0)                    # sin(atan2(y, x))

            # --- theta += td*dt via angle-sum identity; ONE fused EUP push for sin&cos ---
            d = td * DT                                          # [B, 1]
            sc = jnp.sin(jnp.concatenate([d, d + HALF_PI], axis=0))   # [2B, 1], one vreg
            sd = sc[0:batch, :]                                  # sin(d)
            cd = sc[batch:2 * batch, :]                          # cos(d) = sin(d + pi/2)

            c1 = c * cd - s * sd                                 # cos(theta + td*dt)
            s1 = s * cd + c * sd                                 # sin(theta + td*dt)
            td1 = td + DT * (-(G / L) * s1)                      # symplectic Euler velocity

            # --- correction MLP on z1 = [c1, s1, td1], all VPU/XLU (no tiny MXU push) ---
            h = jnp.maximum(c1 * w1_x + s1 * w1_y + td1 * w1_td + b1, 0.0)   # [B, HID]
            x  = c1  + jnp.sum(h * w2_x,  axis=-1, keepdims=True) + b2_x     # [B, 1]
            y  = s1  + jnp.sum(h * w2_y,  axis=-1, keepdims=True) + b2_y
            td = td1 + jnp.sum(h * w2_td, axis=-1, keepdims=True) + b2_td

        # direct per-column stores (no lane concatenate)
        out_ref[:, 0:1] = x
        out_ref[:, 1:2] = y
        out_ref[:, 2:3] = td

    return kernel


# ----------------------------------------------------------------------------
# Wrapper: one gridless pallas_call, 2 inputs (state + packed parameter slab),
# output aliased onto the state buffer.
# ----------------------------------------------------------------------------
def hybrid_dynamics_forward(z, param_slab, k=K_STEPS):
    return pl.pallas_call(
        _make_hybrid_dynamics_kernel(k),
        out_shape=jax.ShapeDtypeStruct(z.shape, jnp.float32),
        in_specs=[_VMEM, _VMEM],
        out_specs=_VMEM,
        input_output_aliases={0: 0},
    )(z, param_slab)


# ----------------------------------------------------------------------------
# Parameter init: build the packed [8, HID] slab directly (kernel layout,
# long dim last), so the forward path has zero per-call layout plumbing.
# ----------------------------------------------------------------------------
def init_params(key):
    k1, k2, k3, k4 = jax.random.split(key, 4)
    s1 = 1.0 / np.sqrt(3.0)     # torch Linear default bound for fan_in=3
    s2 = 1.0 / np.sqrt(HID)     # torch Linear default bound for fan_in=HID
    w1 = jax.random.uniform(k1, (HID, 3), jnp.float32, -s1, s1)   # Linear(3,HID).weight
    b1 = jax.random.uniform(k2, (HID,),   jnp.float32, -s1, s1)
    w2 = jax.random.uniform(k3, (3, HID), jnp.float32, -s2, s2)   # Linear(HID,3).weight
    b2 = jax.random.uniform(k4, (3,),     jnp.float32, -s2, s2)
    slab = jnp.zeros((8, HID), jnp.float32)
    slab = slab.at[0:3, :].set(w1.T)
    slab = slab.at[3, :].set(b1)
    slab = slab.at[4:7, :].set(w2)
    slab = slab.at[7, 0:3].set(b2)
    return slab


# ----------------------------------------------------------------------------
# Pure-JAX reference (independent path: jnp.arctan2 / sin / cos) for checking.
# ----------------------------------------------------------------------------
def reference_forward(z, slab, k=K_STEPS):
    hp = lax.Precision.HIGHEST
    w1t = slab[0:3, :]          # [3, HID]  = W1.T
    b1 = slab[3, :]             # [HID]
    w2t = slab[4:7, :].T        # [HID, 3]  = W2.T
    b2 = slab[7, 0:3]           # [3]
    for _ in range(k):
        x, y, td = z[:, 0], z[:, 1], z[:, 2]
        theta = jnp.arctan2(y, x)
        theta = theta + td * DT
        td = td + DT * (-(G / L) * jnp.sin(theta))
        z = jnp.stack([jnp.cos(theta), jnp.sin(theta), td], axis=1)
        h = jnp.maximum(jnp.dot(z, w1t, precision=hp) + b1, 0.0)
        z = z + (jnp.dot(h, w2t, precision=hp) + b2)
    return z


if __name__ == "__main__":
    key = jax.random.PRNGKey(0)
    pkey, zkey = jax.random.split(key)
    param_slab = init_params(pkey)
    z = jax.random.normal(zkey, (B, 3), jnp.float32)        # state [x, y, theta_dot]

    out = jax.jit(hybrid_dynamics_forward)(z, param_slab)
    out = jax.block_until_ready(out)

    ref = reference_forward(z, param_slab)
    assert out.shape == (B, 3), out.shape
    np.testing.assert_allclose(np.asarray(out), np.asarray(ref), rtol=1e-4, atol=1e-4)
    print("KERNEL_OK")
</pallas_src>

<mosaic_0001>
module attributes {stable_mosaic.version = 11 : i64} {
  func.func @kernel(%arg0: memref<4x3xf32, #tpu.memory_space<vmem>>, %arg1: memref<8x30xf32, #tpu.memory_space<vmem>>, %arg2: memref<4x3xf32, #tpu.memory_space<vmem>>) attributes {dimension_semantics = [], scalar_prefetch = 0 : i64, scratch_operands = 0 : i64, tpu.core_type = #tpu.core_type<tc>} {
    %c0 = arith.constant 0 : index
    %c0_0 = arith.constant 0 : index
    %0 = vector.load %arg1[%c0, %c0_0] : memref<8x30xf32, #tpu.memory_space<vmem>>, vector<8x30xf32>
    %1 = vector.extract_strided_slice %0 {offsets = [0, 0], sizes = [1, 30], strides = [1, 1]} : vector<8x30xf32> to vector<1x30xf32>
    %2 = vector.shape_cast %1 : vector<1x30xf32> to vector<1x30xf32>
    %3 = vector.broadcast %2 : vector<1x30xf32> to vector<4x30xf32>
    %4 = vector.extract_strided_slice %0 {offsets = [1, 0], sizes = [1, 30], strides = [1, 1]} : vector<8x30xf32> to vector<1x30xf32>
    %5 = vector.shape_cast %4 : vector<1x30xf32> to vector<1x30xf32>
    %6 = vector.broadcast %5 : vector<1x30xf32> to vector<4x30xf32>
    %7 = vector.extract_strided_slice %0 {offsets = [2, 0], sizes = [1, 30], strides = [1, 1]} : vector<8x30xf32> to vector<1x30xf32>
    %8 = vector.shape_cast %7 : vector<1x30xf32> to vector<1x30xf32>
    %9 = vector.broadcast %8 : vector<1x30xf32> to vector<4x30xf32>
    %10 = vector.extract_strided_slice %0 {offsets = [3, 0], sizes = [1, 30], strides = [1, 1]} : vector<8x30xf32> to vector<1x30xf32>
    %11 = vector.shape_cast %10 : vector<1x30xf32> to vector<1x30xf32>
    %12 = vector.broadcast %11 : vector<1x30xf32> to vector<4x30xf32>
    %13 = vector.extract_strided_slice %0 {offsets = [4, 0], sizes = [1, 30], strides = [1, 1]} : vector<8x30xf32> to vector<1x30xf32>
    %14 = vector.shape_cast %13 : vector<1x30xf32> to vector<1x30xf32>
    %15 = vector.broadcast %14 : vector<1x30xf32> to vector<4x30xf32>
    %16 = vector.extract_strided_slice %0 {offsets = [5, 0], sizes = [1, 30], strides = [1, 1]} : vector<8x30xf32> to vector<1x30xf32>
    %17 = vector.shape_cast %16 : vector<1x30xf32> to vector<1x30xf32>
    %18 = vector.broadcast %17 : vector<1x30xf32> to vector<4x30xf32>
    %19 = vector.extract_strided_slice %0 {offsets = [6, 0], sizes = [1, 30], strides = [1, 1]} : vector<8x30xf32> to vector<1x30xf32>
    %20 = vector.shape_cast %19 : vector<1x30xf32> to vector<1x30xf32>
    %21 = vector.broadcast %20 : vector<1x30xf32> to vector<4x30xf32>
    %22 = vector.extract_strided_slice %0 {offsets = [7, 0], sizes = [1, 1], strides = [1, 1]} : vector<8x30xf32> to vector<1x1xf32>
    %23 = vector.shape_cast %22 : vector<1x1xf32> to vector<1x1xf32>
    %24 = vector.broadcast %23 : vector<1x1xf32> to vector<4x1xf32>
    %25 = vector.extract_strided_slice %0 {offsets = [7, 1], sizes = [1, 1], strides = [1, 1]} : vector<8x30xf32> to vector<1x1xf32>
    %26 = vector.shape_cast %25 : vector<1x1xf32> to vector<1x1xf32>
    %27 = vector.broadcast %26 : vector<1x1xf32> to vector<4x1xf32>
    %28 = vector.extract_strided_slice %0 {offsets = [7, 2], sizes = [1, 1], strides = [1, 1]} : vector<8x30xf32> to vector<1x1xf32>
    %29 = vector.shape_cast %28 : vector<1x1xf32> to vector<1x1xf32>
    %30 = vector.broadcast %29 : vector<1x1xf32> to vector<4x1xf32>
    %c0_1 = arith.constant 0 : index
    %c0_2 = arith.constant 0 : index
    %31 = vector.load %arg0[%c0_1, %c0_2] : memref<4x3xf32, #tpu.memory_space<vmem>>, vector<4x3xf32>
    %32 = vector.extract_strided_slice %31 {offsets = [0, 0], sizes = [4, 1], strides = [1, 1]} : vector<4x3xf32> to vector<4x1xf32>
    %33 = vector.extract_strided_slice %31 {offsets = [0, 1], sizes = [4, 1], strides = [1, 1]} : vector<4x3xf32> to vector<4x1xf32>
    %34 = vector.extract_strided_slice %31 {offsets = [0, 2], sizes = [4, 1], strides = [1, 1]} : vector<4x3xf32> to vector<4x1xf32>
    %35 = arith.mulf %32, %32 : vector<4x1xf32>
    %36 = arith.mulf %33, %33 : vector<4x1xf32>
    %37 = arith.addf %35, %36 : vector<4x1xf32>
    %cst = arith.constant 1.000000e-30 : f32
    %38 = vector.broadcast %cst : f32 to vector<4x1xf32>
    %39 = arith.maximumf %37, %38 : vector<4x1xf32>
    %40 = math.rsqrt %39 : vector<4x1xf32>
    %cst_3 = arith.constant 0.000000e+00 : f32
    %41 = vector.broadcast %cst_3 : f32 to vector<4x1xf32>
    %42 = arith.cmpf ogt, %37, %41 : vector<4x1xf32>
    %43 = arith.mulf %32, %40 : vector<4x1xf32>
    %cst_4 = arith.constant 1.000000e+00 : f32
    %44 = vector.broadcast %cst_4 : f32 to vector<4x1xf32>
    %45 = arith.select %42, %43, %44 : vector<4x1xi1>, vector<4x1xf32>
    %46 = arith.mulf %33, %40 : vector<4x1xf32>
    %cst_5 = arith.constant 0.000000e+00 : f32
    %47 = vector.broadcast %cst_5 : f32 to vector<4x1xf32>
    %48 = arith.select %42, %46, %47 : vector<4x1xi1>, vector<4x1xf32>
    %cst_6 = arith.constant 1.000000e-01 : f32
    %49 = vector.broadcast %cst_6 : f32 to vector<4x1xf32>
    %50 = arith.mulf %34, %49 : vector<4x1xf32>
    %cst_7 = arith.constant 1.57079637 : f32
    %51 = vector.broadcast %cst_7 : f32 to vector<4x1xf32>
    %52 = arith.addf %50, %51 : vector<4x1xf32>
    %53 = tpu.concatenate %50, %52 in 0 : vector<4x1xf32>, vector<4x1xf32> -> vector<8x1xf32>
    %54 = math.sin %53 : vector<8x1xf32>
    %55 = vector.extract_strided_slice %54 {offsets = [0, 0], sizes = [4, 1], strides = [1, 1]} : vector<8x1xf32> to vector<4x1xf32>
    %56 = vector.extract_strided_slice %54 {offsets = [4, 0], sizes = [4, 1], strides = [1, 1]} : vector<8x1xf32> to vector<4x1xf32>
    %57 = arith.mulf %45, %56 : vector<4x1xf32>
    %58 = arith.mulf %48, %55 : vector<4x1xf32>
    %59 = arith.subf %57, %58 : vector<4x1xf32>
    %60 = arith.mulf %48, %56 : vector<4x1xf32>
    %61 = arith.mulf %45, %55 : vector<4x1xf32>
    %62 = arith.addf %60, %61 : vector<4x1xf32>
    %cst_8 = arith.constant -1.000000e+00 : f32
    %63 = vector.broadcast %cst_8 : f32 to vector<4x1xf32>
    %64 = arith.mulf %63, %62 : vector<4x1xf32>
    %cst_9 = arith.constant 1.000000e-01 : f32
    %65 = vector.broadcast %cst_9 : f32 to vector<4x1xf32>
    %66 = arith.mulf %65, %64 : vector<4x1xf32>
    %67 = arith.addf %34, %66 : vector<4x1xf32>
    %68 = vector.broadcast %59 : vector<4x1xf32> to vector<4x30xf32>
    %69 = arith.mulf %68, %3 : vector<4x30xf32>
    %70 = vector.broadcast %62 : vector<4x1xf32> to vector<4x30xf32>
    %71 = arith.mulf %70, %6 : vector<4x30xf32>
    %72 = arith.addf %69, %71 : vector<4x30xf32>
    %73 = vector.broadcast %67 : vector<4x1xf32> to vector<4x30xf32>
    %74 = arith.mulf %73, %9 : vector<4x30xf32>
    %75 = arith.addf %72, %74 : vector<4x30xf32>
    %76 = arith.addf %75, %12 : vector<4x30xf32>
    %cst_10 = arith.constant 0.000000e+00 : f32
    %77 = vector.broadcast %cst_10 : f32 to vector<4x30xf32>
    %78 = arith.maximumf %76, %77 : vector<4x30xf32>
    %79 = arith.mulf %78, %15 : vector<4x30xf32>
    %cst_11 = arith.constant dense<0.000000e+00> : vector<4xf32>
    %80 = vector.multi_reduction <add>, %79, %cst_11 [1] : vector<4x30xf32> to vector<4xf32>
    %81 = vector.shape_cast %80 : vector<4xf32> to vector<4x1xf32>
    %82 = arith.addf %59, %81 : vector<4x1xf32>
    %83 = arith.addf %82, %24 : vector<4x1xf32>
    %84 = arith.mulf %78, %18 : vector<4x30xf32>
    %cst_12 = arith.constant dense<0.000000e+00> : vector<4xf32>
    %85 = vector.multi_reduction <add>, %84, %cst_12 [1] : vector<4x30xf32> to vector<4xf32>
    %86 = vector.shape_cast %85 : vector<4xf32> to vector<4x1xf32>
    %87 = arith.addf %62, %86 : vector<4x1xf32>
    %88 = arith.addf %87, %27 : vector<4x1xf32>
    %89 = arith.mulf %78, %21 : vector<4x30xf32>
    %cst_13 = arith.constant dense<0.000000e+00> : vector<4xf32>
    %90 = vector.multi_reduction <add>, %89, %cst_13 [1] : vector<4x30xf32> to vector<4xf32>
    %91 = vector.shape_cast %90 : vector<4xf32> to vector<4x1xf32>
    %92 = arith.addf %67, %91 : vector<4x1xf32>
    %93 = arith.addf %92, %30 : vector<4x1xf32>
    %94 = arith.mulf %83, %83 : vector<4x1xf32>
    %95 = arith.mulf %88, %88 : vector<4x1xf32>
    %96 = arith.addf %94, %95 : vector<4x1xf32>
    %cst_14 = arith.constant 1.000000e-30 : f32
    %97 = vector.broadcast %cst_14 : f32 to vector<4x1xf32>
    %98 = arith.maximumf %96, %97 : vector<4x1xf32>
    %99 = math.rsqrt %98 : vector<4x1xf32>
    %cst_15 = arith.constant 0.000000e+00 : f32
    %100 = vector.broadcast %cst_15 : f32 to vector<4x1xf32>
    %101 = arith.cmpf ogt, %96, %100 : vector<4x1xf32>
    %102 = arith.mulf %83, %99 : vector<4x1xf32>
    %cst_16 = arith.constant 1.000000e+00 : f32
    %103 = vector.broadcast %cst_16 : f32 to vector<4x1xf32>
    %104 = arith.select %101, %102, %103 : vector<4x1xi1>, vector<4x1xf32>
    %105 = arith.mulf %88, %99 : vector<4x1xf32>
    %cst_17 = arith.constant 0.000000e+00 : f32
    %106 = vector.broadcast %cst_17 : f32 to vector<4x1xf32>
    %107 = arith.select %101, %105, %106 : vector<4x1xi1>, vector<4x1xf32>
    %cst_18 = arith.constant 1.000000e-01 : f32
    %108 = vector.broadcast %cst_18 : f32 to vector<4x1xf32>
    %109 = arith.mulf %93, %108 : vector<4x1xf32>
    %cst_19 = arith.constant 1.57079637 : f32
    %110 = vector.broadcast %cst_19 : f32 to vector<4x1xf32>
    %111 = arith.addf %109, %110 : vector<4x1xf32>
    %112 = tpu.concatenate %109, %111 in 0 : vector<4x1xf32>, vector<4x1xf32> -> vector<8x1xf32>
    %113 = math.sin %112 : vector<8x1xf32>
    %114 = vector.extract_strided_slice %113 {offsets = [0, 0], sizes = [4, 1], strides = [1, 1]} : vector<8x1xf32> to vector<4x1xf32>
    %115 = vector.extract_strided_slice %113 {offsets = [4, 0], sizes = [4, 1], strides = [1, 1]} : vector<8x1xf32> to vector<4x1xf32>
    %116 = arith.mulf %104, %115 : vector<4x1xf32>
    %117 = arith.mulf %107, %114 : vector<4x1xf32>
    %118 = arith.subf %116, %117 : vector<4x1xf32>
    %119 = arith.mulf %107, %115 : vector<4x1xf32>
    %120 = arith.mulf %104, %114 : vector<4x1xf32>
    %121 = arith.addf %119, %120 : vector<4x1xf32>
    %cst_20 = arith.constant -1.000000e+00 : f32
    %122 = vector.broadcast %cst_20 : f32 to vector<4x1xf32>
    %123 = arith.mulf %122, %121 : vector<4x1xf32>
    %cst_21 = arith.constant 1.000000e-01 : f32
    %124 = vector.broadcast %cst_21 : f32 to vector<4x1xf32>
    %125 = arith.mulf %124, %123 : vector<4x1xf32>
    %126 = arith.addf %93, %125 : vector<4x1xf32>
    %127 = vector.broadcast %118 : vector<4x1xf32> to vector<4x30xf32>
    %128 = arith.mulf %127, %3 : vector<4x30xf32>
    %129 = vector.broadcast %121 : vector<4x1xf32> to vector<4x30xf32>
    %130 = arith.mulf %129, %6 : vector<4x30xf32>
    %131 = arith.addf %128, %130 : vector<4x30xf32>
    %132 = vector.broadcast %126 : vector<4x1xf32> to vector<4x30xf32>
    %133 = arith.mulf %132, %9 : vector<4x30xf32>
    %134 = arith.addf %131, %133 : vector<4x30xf32>
    %135 = arith.addf %134, %12 : vector<4x30xf32>
    %cst_22 = arith.constant 0.000000e+00 : f32
    %136 = vector.broadcast %cst_22 : f32 to vector<4x30xf32>
    %137 = arith.maximumf %135, %136 : vector<4x30xf32>
    %138 = arith.mulf %137, %15 : vector<4x30xf32>
    %cst_23 = arith.constant dense<0.000000e+00> : vector<4xf32>
    %139 = vector.multi_reduction <add>, %138, %cst_23 [1] : vector<4x30xf32> to vector<4xf32>
    %140 = vector.shape_cast %139 : vector<4xf32> to vector<4x1xf32>
    %141 = arith.addf %118, %140 : vector<4x1xf32>
    %142 = arith.addf %141, %24 : vector<4x1xf32>
    %143 = arith.mulf %137, %18 : vector<4x30xf32>
    %cst_24 = arith.constant dense<0.000000e+00> : vector<4xf32>
    %144 = vector.multi_reduction <add>, %143, %cst_24 [1] : vector<4x30xf32> to vector<4xf32>
    %145 = vector.shape_cast %144 : vector<4xf32> to vector<4x1xf32>
    %146 = arith.addf %121, %145 : vector<4x1xf32>
    %147 = arith.addf %146, %27 : vector<4x1xf32>
    %148 = arith.mulf %137, %21 : vector<4x30xf32>
    %cst_25 = arith.constant dense<0.000000e+00> : vector<4xf32>
    %149 = vector.multi_reduction <add>, %148, %cst_25 [1] : vector<4x30xf32> to vector<4xf32>
    %150 = vector.shape_cast %149 : vector<4xf32> to vector<4x1xf32>
    %151 = arith.addf %126, %150 : vector<4x1xf32>
    %152 = arith.addf %151, %30 : vector<4x1xf32>
    %153 = arith.mulf %142, %142 : vector<4x1xf32>
    %154 = arith.mulf %147, %147 : vector<4x1xf32>
    %155 = arith.addf %153, %154 : vector<4x1xf32>
    %cst_26 = arith.constant 1.000000e-30 : f32
    %156 = vector.broadcast %cst_26 : f32 to vector<4x1xf32>
    %157 = arith.maximumf %155, %156 : vector<4x1xf32>
    %158 = math.rsqrt %157 : vector<4x1xf32>
    %cst_27 = arith.constant 0.000000e+00 : f32
    %159 = vector.broadcast %cst_27 : f32 to vector<4x1xf32>
    %160 = arith.cmpf ogt, %155, %159 : vector<4x1xf32>
    %161 = arith.mulf %142, %158 : vector<4x1xf32>
    %cst_28 = arith.constant 1.000000e+00 : f32
    %162 = vector.broadcast %cst_28 : f32 to vector<4x1xf32>
    %163 = arith.select %160, %161, %162 : vector<4x1xi1>, vector<4x1xf32>
    %164 = arith.mulf %147, %158 : vector<4x1xf32>
    %cst_29 = arith.constant 0.000000e+00 : f32
    %165 = vector.broadcast %cst_29 : f32 to vector<4x1xf32>
    %166 = arith.select %160, %164, %165 : vector<4x1xi1>, vector<4x1xf32>
    %cst_30 = arith.constant 1.000000e-01 : f32
    %167 = vector.broadcast %cst_30 : f32 to vector<4x1xf32>
    %168 = arith.mulf %152, %167 : vector<4x1xf32>
    %cst_31 = arith.constant 1.57079637 : f32
    %169 = vector.broadcast %cst_31 : f32 to vector<4x1xf32>
    %170 = arith.addf %168, %169 : vector<4x1xf32>
    %171 = tpu.concatenate %168, %170 in 0 : vector<4x1xf32>, vector<4x1xf32> -> vector<8x1xf32>
    %172 = math.sin %171 : vector<8x1xf32>
    %173 = vector.extract_strided_slice %172 {offsets = [0, 0], sizes = [4, 1], strides = [1, 1]} : vector<8x1xf32> to vector<4x1xf32>
    %174 = vector.extract_strided_slice %172 {offsets = [4, 0], sizes = [4, 1], strides = [1, 1]} : vector<8x1xf32> to vector<4x1xf32>
    %175 = arith.mulf %163, %174 : vector<4x1xf32>
    %176 = arith.mulf %166, %173 : vector<4x1xf32>
    %177 = arith.subf %175, %176 : vector<4x1xf32>
    %178 = arith.mulf %166, %174 : vector<4x1xf32>
    %179 = arith.mulf %163, %173 : vector<4x1xf32>
    %180 = arith.addf %178, %179 : vector<4x1xf32>
    %cst_32 = arith.constant -1.000000e+00 : f32
    %181 = vector.broadcast %cst_32 : f32 to vector<4x1xf32>
    %182 = arith.mulf %181, %180 : vector<4x1xf32>
    %cst_33 = arith.constant 1.000000e-01 : f32
    %183 = vector.broadcast %cst_33 : f32 to vector<4x1xf32>
    %184 = arith.mulf %183, %182 : vector<4x1xf32>
    %185 = arith.addf %152, %184 : vector<4x1xf32>
    %186 = vector.broadcast %177 : vector<4x1xf32> to vector<4x30xf32>
    %187 = arith.mulf %186, %3 : vector<4x30xf32>
    %188 = vector.broadcast %180 : vector<4x1xf32> to vector<4x30xf32>
    %189 = arith.mulf %188, %6 : vector<4x30xf32>
    %190 = arith.addf %187, %189 : vector<4x30xf32>
    %191 = vector.broadcast %185 : vector<4x1xf32> to vector<4x30xf32>
    %192 = arith.mulf %191, %9 : vector<4x30xf32>
    %193 = arith.addf %190, %192 : vector<4x30xf32>
    %194 = arith.addf %193, %12 : vector<4x30xf32>
    %cst_34 = arith.constant 0.000000e+00 : f32
    %195 = vector.broadcast %cst_34 : f32 to vector<4x30xf32>
    %196 = arith.maximumf %194, %195 : vector<4x30xf32>
    %197 = arith.mulf %196, %15 : vector<4x30xf32>
    %cst_35 = arith.constant dense<0.000000e+00> : vector<4xf32>
    %198 = vector.multi_reduction <add>, %197, %cst_35 [1] : vector<4x30xf32> to vector<4xf32>
    %199 = vector.shape_cast %198 : vector<4xf32> to vector<4x1xf32>
    %200 = arith.addf %177, %199 : vector<4x1xf32>
    %201 = arith.addf %200, %24 : vector<4x1xf32>
    %202 = arith.mulf %196, %18 : vector<4x30xf32>
    %cst_36 = arith.constant dense<0.000000e+00> : vector<4xf32>
    %203 = vector.multi_reduction <add>, %202, %cst_36 [1] : vector<4x30xf32> to vector<4xf32>
    %204 = vector.shape_cast %203 : vector<4xf32> to vector<4x1xf32>
    %205 = arith.addf %180, %204 : vector<4x1xf32>
    %206 = arith.addf %205, %27 : vector<4x1xf32>
    %207 = arith.mulf %196, %21 : vector<4x30xf32>
    %cst_37 = arith.constant dense<0.000000e+00> : vector<4xf32>
    %208 = vector.multi_reduction <add>, %207, %cst_37 [1] : vector<4x30xf32> to vector<4xf32>
    %209 = vector.shape_cast %208 : vector<4xf32> to vector<4x1xf32>
    %210 = arith.addf %185, %209 : vector<4x1xf32>
    %211 = arith.addf %210, %30 : vector<4x1xf32>
    %212 = arith.mulf %201, %201 : vector<4x1xf32>
    %213 = arith.mulf %206, %206 : vector<4x1xf32>
    %214 = arith.addf %212, %213 : vector<4x1xf32>
    %cst_38 = arith.constant 1.000000e-30 : f32
    %215 = vector.broadcast %cst_38 : f32 to vector<4x1xf32>
    %216 = arith.maximumf %214, %215 : vector<4x1xf32>
    %217 = math.rsqrt %216 : vector<4x1xf32>
    %cst_39 = arith.constant 0.000000e+00 : f32
    %218 = vector.broadcast %cst_39 : f32 to vector<4x1xf32>
    %219 = arith.cmpf ogt, %214, %218 : vector<4x1xf32>
    %220 = arith.mulf %201, %217 : vector<4x1xf32>
    %cst_40 = arith.constant 1.000000e+00 : f32
    %221 = vector.broadcast %cst_40 : f32 to vector<4x1xf32>
    %222 = arith.select %219, %220, %221 : vector<4x1xi1>, vector<4x1xf32>
    %223 = arith.mulf %206, %217 : vector<4x1xf32>
    %cst_41 = arith.constant 0.000000e+00 : f32
    %224 = vector.broadcast %cst_41 : f32 to vector<4x1xf32>
    %225 = arith.select %219, %223, %224 : vector<4x1xi1>, vector<4x1xf32>
    %cst_42 = arith.constant 1.000000e-01 : f32
    %226 = vector.broadcast %cst_42 : f32 to vector<4x1xf32>
    %227 = arith.mulf %211, %226 : vector<4x1xf32>
    %cst_43 = arith.constant 1.57079637 : f32
    %228 = vector.broadcast %cst_43 : f32 to vector<4x1xf32>
    %229 = arith.addf %227, %228 : vector<4x1xf32>
    %230 = tpu.concatenate %227, %229 in 0 : vector<4x1xf32>, vector<4x1xf32> -> vector<8x1xf32>
    %231 = math.sin %230 : vector<8x1xf32>
    %232 = vector.extract_strided_slice %231 {offsets = [0, 0], sizes = [4, 1], strides = [1, 1]} : vector<8x1xf32> to vector<4x1xf32>
    %233 = vector.extract_strided_slice %231 {offsets = [4, 0], sizes = [4, 1], strides = [1, 1]} : vector<8x1xf32> to vector<4x1xf32>
    %234 = arith.mulf %222, %233 : vector<4x1xf32>
    %235 = arith.mulf %225, %232 : vector<4x1xf32>
    %236 = arith.subf %234, %235 : vector<4x1xf32>
    %237 = arith.mulf %225, %233 : vector<4x1xf32>
    %238 = arith.mulf %222, %232 : vector<4x1xf32>
    %239 = arith.addf %237, %238 : vector<4x1xf32>
    %cst_44 = arith.constant -1.000000e+00 : f32
    %240 = vector.broadcast %cst_44 : f32 to vector<4x1xf32>
    %241 = arith.mulf %240, %239 : vector<4x1xf32>
    %cst_45 = arith.constant 1.000000e-01 : f32
    %242 = vector.broadcast %cst_45 : f32 to vector<4x1xf32>
    %243 = arith.mulf %242, %241 : vector<4x1xf32>
    %244 = arith.addf %211, %243 : vector<4x1xf32>
    %245 = vector.broadcast %236 : vector<4x1xf32> to vector<4x30xf32>
    %246 = arith.mulf %245, %3 : vector<4x30xf32>
    %247 = vector.broadcast %239 : vector<4x1xf32> to vector<4x30xf32>
    %248 = arith.mulf %247, %6 : vector<4x30xf32>
    %249 = arith.addf %246, %248 : vector<4x30xf32>
    %250 = vector.broadcast %244 : vector<4x1xf32> to vector<4x30xf32>
    %251 = arith.mulf %250, %9 : vector<4x30xf32>
    %252 = arith.addf %249, %251 : vector<4x30xf32>
    %253 = arith.addf %252, %12 : vector<4x30xf32>
    %cst_46 = arith.constant 0.000000e+00 : f32
    %254 = vector.broadcast %cst_46 : f32 to vector<4x30xf32>
    %255 = arith.maximumf %253, %254 : vector<4x30xf32>
    %256 = arith.mulf %255, %15 : vector<4x30xf32>
    %cst_47 = arith.constant dense<0.000000e+00> : vector<4xf32>
    %257 = vector.multi_reduction <add>, %256, %cst_47 [1] : vector<4x30xf32> to vector<4xf32>
    %258 = vector.shape_cast %257 : vector<4xf32> to vector<4x1xf32>
    %259 = arith.addf %236, %258 : vector<4x1xf32>
    %260 = arith.addf %259, %24 : vector<4x1xf32>
    %261 = arith.mulf %255, %18 : vector<4x30xf32>
    %cst_48 = arith.constant dense<0.000000e+00> : vector<4xf32>
    %262 = vector.multi_reduction <add>, %261, %cst_48 [1] : vector<4x30xf32> to vector<4xf32>
    %263 = vector.shape_cast %262 : vector<4xf32> to vector<4x1xf32>
    %264 = arith.addf %239, %263 : vector<4x1xf32>
    %265 = arith.addf %264, %27 : vector<4x1xf32>
    %266 = arith.mulf %255, %21 : vector<4x30xf32>
    %cst_49 = arith.constant dense<0.000000e+00> : vector<4xf32>
    %267 = vector.multi_reduction <add>, %266, %cst_49 [1] : vector<4x30xf32> to vector<4xf32>
    %268 = vector.shape_cast %267 : vector<4xf32> to vector<4x1xf32>
    %269 = arith.addf %244, %268 : vector<4x1xf32>
    %270 = arith.addf %269, %30 : vector<4x1xf32>
    %c0_50 = arith.constant 0 : index
    %c0_51 = arith.constant 0 : index
    %271 = vector.load %arg2[%c0_50, %c0_51] : memref<4x3xf32, #tpu.memory_space<vmem>>, vector<4x1xf32>
    tpu.vector_store %arg2[%c0_50, %c0_51], %260 {strides = array<i32>} : memref<4x3xf32, #tpu.memory_space<vmem>>, vector<4x1xf32>,
    %c0_52 = arith.constant 0 : index
    %c1 = arith.constant 1 : index
    %272 = vector.load %arg2[%c0_52, %c1] : memref<4x3xf32, #tpu.memory_space<vmem>>, vector<4x1xf32>
    tpu.vector_store %arg2[%c0_52, %c1], %265 {strides = array<i32>} : memref<4x3xf32, #tpu.memory_space<vmem>>, vector<4x1xf32>,
    %c0_53 = arith.constant 0 : index
    %c2 = arith.constant 2 : index
    %273 = vector.load %arg2[%c0_53, %c2] : memref<4x3xf32, #tpu.memory_space<vmem>>, vector<4x1xf32>
    tpu.vector_store %arg2[%c0_53, %c2], %270 {strides = array<i32>} : memref<4x3xf32, #tpu.memory_space<vmem>>, vector<4x1xf32>,
    return
  }
}

</mosaic_0001>

<bundles_post_ra>
// kernel: hybrid_dynamics_forward.1
= control target key start
LH: loop header
LB: loop body
LE: loop exit
PB: predicated region body
PF: predicated region fallthrough
CT: control target
= control target key end

     0   :  { %7 = vsyncpa [#allocation3], 0  ;;  %s1563_s0 = inlined_call_operand.hbm [shape: f32[4,3], index: 0, kind: input, shape index: {}, may-alias: {0,2}]   ;;  %s1564_s1 = inlined_call_operand.vmem [shape: f32[8,30], index: 1, kind: input, shape index: {}]   ;;  %s1565_s2 = inlined_call_operand.hbm [shape: f32[4,3], index: 2, kind: output, shape index: {}, may-alias: {0,2}]  }
   0x1   :  { %8 = vsyncpa [#allocation4], 0  ;;  %s14_s11 = sshll.u32 %s1563_s0, 4  ;;  %s1134_s12 = smov [#allocation2]   ;;  %s15_s11 = int_to_ptr.hbm [resolvable:$true] %s14_s11 }
   0x2   :  { %s16_s13 = sshll.u32 %s1134_s12, 4  ;;  %s17_s13 = int_to_ptr.vmem [resolvable:$true] %s16_s13 }
   0x3   :  { %19 = dma.hbm_to_vmem [thread:$0]  %s15_s11, 64, %s17_s13, [#allocation3]  }
   0x4   :  { %1130 = dma.done.wait [#allocation3], 64  }
   0x5   :  { %1131 = vsyncadd [#allocation3], 4294967232  ;;  %v1166_v0 = vld [vmem:[#allocation2] sm:$0xf]  ;;  %s1135_s14 = smov 127   ;;  %vm71_vm0 = vcmask 1043456  }
   0x6   :  { %v1170_v1 = vmul.f32 %v1166_v0, %v1166_v0  ;;  %v66_v2 = vmul.f32 0.1, %v1166_v0  ;;  %v1136_v5 = vmov 0   ;;  %v1137_v18 = vmov 683565275   ;;  %s1143_s0 = smov 126  }
   0x7   :  { %1071 = vset.pattern.permute.xlu1 %v1136_v5  ;;  %1070 = vset.pattern.permute.xlu0 %v1136_v5  ;;  %v1138_v20 = vmov 2475754826   ;;  %v1139_v22 = vmov 2131351028   ;;  %v1140_v24 = vmov 2102212464  }
   0x8   :  { %38 = vrot.lane.b32.xlu0 %v1170_v1, %s1135_s14  ;;  %v67_v3 = vadd.f32 1.5707964, %v66_v2  ;;  %v1141_v26 = vmov 920167782   ;;  %v1142_v32 = vmov 1326507024  }
   0x9   :  { %s1144_s15 = smov 1   ;;  %s1145_s16 = smov 2  }
   0xa   :  { %v69_v4 = vrot.slane %v67_v3, 4  ;;  %s1034_s22 = sshll.u32 %s1565_s2, 4  ;;  %s1035_s22 = int_to_ptr.hbm [resolvable:$true] %s1034_s22 }
   0xc   :  { %v1178_v6 = vsel %vm71_vm0, %v66_v2, %v69_v4 }
   0xd   :  { %v76_v7 = vand.u32 2139095040, %v1178_v6  ;;  %v73_v9 = vand.u32 2147483647, %v1178_v6  ;;  %vm75_vm13 = vcmp.lt.s32.totalorder %v1178_v6, 0 }
   0xf   :  { %v77_v8 = vshrl.u32 %v76_v7, 23  ;;  %v80_v12 = vand.u32 8388607, %v73_v9  ;;  %vm74_vm14 = vcmp.le.f32.partialorder %v73_v9, 0.7853982 }
  0x11   :  { %v1044_v10 = vadd.s32 4294967169, %v77_v8  ;;  %v81_v15 = vor.u32 8388608, %v80_v12 }
  0x13   :  { %v83_v11 = vadd.s32 1, %v1044_v10  ;;  %v1197_v34 = vshll.u32 %v81_v15, 8 }
  0x15   :  { %vm84_vm1 = vcmp.gt.s32.totalorder %v83_v11, 0  ;;  %v122_v46 = vand.u32 65535, %v1197_v34  ;;  %v123_v47 = vshrl.u32 %v1197_v34, 16 }
  0x16   :  { %v85_v13 = vsel %vm84_vm1, %v83_v11, 0 }
  0x17   :  { %v87_v14 = vand.u32 31, %v85_v13  ;;  %v1184_v16 = vshrl.u32 %v85_v13, 5 }
  0x19   :  { %v88_v17 = vsub.s32 32, %v87_v14  ;;  %v90_v19 = vshll.u32 %v1137_v18, %v87_v14  ;;  %v93_v21 = vshll.u32 %v1138_v20, %v87_v14  ;;  %v96_v23 = vshll.u32 %v1139_v22, %v87_v14 }
  0x1a   :  { %v99_v25 = vshll.u32 %v1140_v24, %v87_v14  ;;  %v102_v27 = vshll.u32 %v1141_v26, %v87_v14  ;;  %vm105_vm2 = vcmp.lt.s32.totalorder %v1184_v16, 1  ;;  %vm108_vm3 = vcmp.lt.s32.totalorder %v1184_v16, 4 }
  0x1b   :  { %v91_v28 = vshrl.u32 %v1138_v20, %v88_v17  ;;  %v94_v29 = vshrl.u32 %v1139_v22, %v88_v17  ;;  %v97_v30 = vshrl.u32 %v1140_v24, %v88_v17  ;;  %v100_v31 = vshrl.u32 %v1141_v26, %v88_v17 }
  0x1c   :  { %v103_v33 = vshrl.u32 %v1142_v32, %v88_v17  ;;  %vm107_vm4 = vcmp.lt.s32.totalorder %v1184_v16, 3  ;;  %vm106_vm5 = vcmp.lt.s32.totalorder %v1184_v16, 2  ;;  %v89_v54 = vshrl.u32 %v1137_v18, %v88_v17 }
  0x1d   :  { %v92_v35 = vor.u32 %v91_v28, %v90_v19  ;;  %v95_v36 = vor.u32 %v94_v29, %v93_v21  ;;  %v98_v37 = vor.u32 %v97_v30, %v96_v23  ;;  %v101_v38 = vor.u32 %v100_v31, %v99_v25 }
  0x1e   :  { %v104_v39 = vor.u32 %v103_v33, %v102_v27 }
  0x1f   :  { %v113_v40 = vsel %vm105_vm2, %v92_v35, %v95_v36  ;;  %v117_v41 = vsel %vm105_vm2, %v95_v36, %v98_v37  ;;  %v114_v42 = vsel %vm108_vm3, %v101_v38, 920167782  ;;  %v109_v7 = vsel %vm105_vm2, %v89_v54, %v92_v35 }
  0x20   :  { %v118_v43 = vsel %vm108_vm3, %v104_v39, 1326507024  ;;  %v115_v44 = vsel %vm107_vm4, %v98_v37, %v114_v42  ;;  %v110_v10 = vsel %vm108_vm3, %v98_v37, 2102212464  ;;  %vm216_vm3 = vweird.f32 %v1178_v6 }
  0x21   :  { %v119_v45 = vsel %vm107_vm4, %v101_v38, %v118_v43  ;;  %v116_v48 = vsel %vm106_vm5, %v113_v40, %v115_v44  ;;  %v111_v23 = vsel %vm107_vm4, %v95_v36, %v110_v10 }
  0x22   :  { %v120_v49 = vsel %vm106_vm5, %v117_v41, %v119_v45  ;;  %v146_v52 = vand.u32 65535, %v116_v48  ;;  %v147_v53 = vshrl.u32 %v116_v48, 16  ;;  %v112_v35 = vsel %vm106_vm5, %v109_v7, %v111_v23 }
  0x23   :  { %v124_v50 = vand.u32 65535, %v120_v49  ;;  %v125_v51 = vshrl.u32 %v120_v49, 16  ;;  %v166_v40 = vmul.u32 %v1197_v34, %v112_v35 }
  0x24   :  { %v148_v58 = vmul.u32 %v146_v52, %v122_v46  ;;  %v149_v59 = vmul.u32 %v147_v53, %v122_v46  ;;  %v150_v60 = vmul.u32 %v146_v52, %v123_v47  ;;  %v151_v2 = vmul.u32 %v147_v53, %v123_v47 }
  0x25   :  { %v126_v55 = vmul.u32 %v124_v50, %v122_v46  ;;  %v127_v56 = vmul.u32 %v125_v51, %v122_v46  ;;  %v128_v57 = vmul.u32 %v124_v50, %v123_v47  ;;  %v129_v61 = vmul.u32 %v125_v51, %v123_v47 }
  0x26   :  { %v152_v3 = vshll.u32 %v149_v59, 16  ;;  %v154_v4 = vshll.u32 %v150_v60, 16  ;;  %v153_v19 = vshrl.u32 %v149_v59, 16  ;;  %v155_v29 = vshrl.u32 %v150_v60, 16 }
  0x27   :  { %v130_v62 = vshll.u32 %v127_v56, 16  ;;  %v132_v63 = vshll.u32 %v128_v57, 16  ;;  %v131_v13 = vshrl.u32 %v127_v56, 16  ;;  %v133_v25 = vshrl.u32 %v128_v57, 16 }
  0x28   :  { %vm156_vm7 = vc.u32 %v148_v58, %v152_v3  ;;  %v158_v12 = vadd.s32 %v152_v3, %v148_v58 }
  0x29   :  { %vm134_vm6 = vc.u32 %v126_v55, %v130_v62  ;;  %v136_v8 = vadd.s32 %v130_v62, %v126_v55  ;;  %v157_v15 = vsel %vm156_vm7, 1, %v1136_v5 }
  0x2a   :  { %v135_v11 = vsel %vm134_vm6, 1, %v1136_v5  ;;  %v159_v21 = vadd.s32 %v157_v15, %v151_v2  ;;  %vm160_vm9 = vc.u32 %v158_v12, %v154_v4  ;;  %v162_v33 = vadd.s32 %v158_v12, %v154_v4 }
  0x2b   :  { %v137_v14 = vadd.s32 %v135_v11, %v129_v61  ;;  %vm138_vm8 = vc.u32 %v136_v8, %v132_v63  ;;  %v161_v28 = vsel %vm160_vm9, 1, %v1136_v5 }
  0x2c   :  { %v139_v17 = vsel %vm138_vm8, 1, %v1136_v5  ;;  %v163_v30 = vadd.s32 %v161_v28, %v159_v21  ;;  %vm272_vm8 = vcmask 240640  }
  0x2d   :  { %v141_v27 = vadd.s32 %v139_v17, %v137_v14 }
  0x2e   :  { %v164_v37 = vadd.s32 %v163_v30, %v153_v19 }
  0x2f   :  { %v142_v31 = vadd.s32 %v141_v27, %v131_v13 }
  0x30   :  { %v165_v39 = vadd.s32 %v164_v37, %v155_v29 }
  0x31   :  { %v143_v38 = vadd.s32 %v142_v31, %v133_v25 }
  0x32   :  { %v169_v41 = vadd.s32 1, %v165_v39 }
  0x33   :  { %vm168_vm10 = vc.u32 %v143_v38, %v162_v33  ;;  %v167_v16 = vadd.s32 %v162_v33, %v143_v38 }
  0x34   :  { %v170_v42 = vsel %vm168_vm10, %v169_v41, %v165_v39 }
  0x35   :  { %v171_v36 = vadd.s32 %v170_v42, %v166_v40 }
  0x37   :  { %v172_v43 = vadd.s32 536870912, %v171_v36 }
  0x39   :  { %v173_v44 = vshrl.u32 %v172_v43, 30 }
  0x3b   :  { %v174_v45 = vshll.u32 %v173_v44, 30  ;;  %v197_v62 = vsub.s32 4, %v173_v44 }
  0x3d   :  { %v175_v46 = vsub.s32 %v171_v36, %v174_v45  ;;  %v198_v3 = vsel %vm75_vm13, %v197_v62, %v173_v44 }
  0x3e   :  { %v200_v8 = vsel %vm74_vm14, 0, %v198_v3 }
  0x3f   :  { %vm176_vm11 = vcmp.lt.s32.totalorder %v175_v46, 0  ;;  %v177_v47 = vsub.s32 0, %v175_v46  ;;  %v217_v14 = vadd.s32 3, %v200_v8 }
  0x41   :  { %v178_v48 = vsel %vm176_vm11, %v177_v47, %v175_v46  ;;  %v218_v23 = vand.u32 3, %v217_v14 }
  0x42   :  { %v179_v49 = vclz %v178_v48 }
  0x43   :  { %vm223_vm15 = vcmp.eq.s32.totalorder %v218_v23, 2  ;;  %vm220_vm1 = vcmp.eq.s32.totalorder %v218_v23, 0  ;;  %vm219_vm2 = vcmp.lt.s32.totalorder %v218_v23, 2 }
  0x44   :  { %v1045_v50 = vadd.s32 4294967294, %v179_v49 }
  0x46   :  { %vm1046_vm12 = vcmp.lt.s32.totalorder %v1045_v50, 0 }
  0x47   :  { %v182_v51 = vsel %vm1046_vm12, 0, %v1045_v50 }
  0x48   :  { %v183_v52 = vsub.s32 32, %v182_v51  ;;  %v184_v53 = vshll.u32 %v175_v46, %v182_v51  ;;  %v187_v54 = vsub.s32 4294967266, %v182_v51 }
  0x4a   :  { %v185_v34 = vshrl.u32 %v167_v16, %v183_v52  ;;  %v188_v55 = vadd.s32 127, %v187_v54 }
  0x4c   :  { %v186_v56 = vor.u32 %v185_v34, %v184_v53  ;;  %v189_v57 = vshll.u32 %v188_v55, 23 }
  0x4e   :  { %v190_v58 = vor.u32 4788187, %v189_v57  ;;  %v193_v59 = vcvt.s32.f32 %v186_v56 }
  0x50   :  { %v191_v60 = vand.u32 2147483647, %v190_v58 }
  0x52   :  { %v194_v61 = vmul.f32 %v193_v59, %v191_v60 }
  0x54   :  { %v195_v63 = vxor.u32 2147483648, %v194_v61 }
  0x56   :  { %v196_v2 = vsel %vm75_vm13, %v195_v63, %v194_v61  ;;  %v1146_v61 = vmov 2  }
  0x57   :  { %v199_v4 = vsel %vm74_vm14, %v1178_v6, %v196_v2  ;;  %1072 = vset.pattern.permute.xlu2 %v1146_v61  ;;  %v26_v2 = vld [vmem:[%s1564_s1] sm:$0xff]  ;;  %s1147_s1 = smov [#allocation5]  }
  0x58   :  { %v201_v7 = vmul.f32 %v199_v4, %v199_v4  ;;  %v1259_v3 = vperm.slane %v26_v2, 1  ;;  %v1273_v23 = vperm.slane %v26_v2, 5  ;;  %s1032_s19 = sshll.u32 %s1147_s1, 4  ;;  %s1033_s19 = int_to_ptr.vmem [resolvable:$true] %s1032_s19 }
  0x5a   :  { %v202_v10 = vmul.f32 -0.001358992, %v201_v7  ;;  %v209_v11 = vmul.f32 -0.00019511016, %v201_v7 }
  0x5c   :  { %v203_v12 = vadd.f32 0.041655596, %v202_v10  ;;  %v210_v13 = vadd.f32 0.008332121, %v209_v11 }
  0x5e   :  { %v204_v15 = vmul.f32 %v203_v12, %v201_v7  ;;  %v211_v17 = vmul.f32 %v210_v13, %v201_v7  ;;  %v1265_v12 = vperm.slane %v26_v2, 2 }
  0x60   :  { %v205_v19 = vadd.f32 -0.4999988, %v204_v15  ;;  %v212_v21 = vadd.f32 -0.16666654, %v211_v17 }
  0x62   :  { %v206_v25 = vmul.f32 %v205_v19, %v201_v7  ;;  %v213_v27 = vmul.f32 %v212_v21, %v201_v7  ;;  %v1271_v21 = vperm.slane %v26_v2, 6 }
  0x64   :  { %v207_v9 = vadd.f32 1.0, %v206_v25  ;;  %v214_v28 = vadd.f32 1.0, %v213_v27  ;;  %v1275_v25 = vperm.slane %v26_v2, 4 }
  0x66   :  { %v215_v29 = vmul.f32 %v214_v28, %v199_v4  ;;  %v224_v30 = vxor.u32 2147483648, %v207_v9  ;;  %v1261_v4 = vperm.slane %v26_v2, 0 }
  0x68   :  { %v221_v31 = vxor.u32 2147483648, %v215_v29  ;;  %v225_v33 = vsel %vm223_vm15, %v224_v30, %v215_v29 }
  0x6a   :  { %v222_v35 = vsel %vm220_vm1, %v207_v9, %v221_v31 }
  0x6b   :  { %v226_v37 = vsel %vm219_vm2, %v222_v35, %v225_v33  ;;  %v1283_v35 = vperm.slane %v26_v2, 7 }
  0x6c   :  { %v227_v38 = vsel %vm216_vm3, nan, %v226_v37 }
  0x6d   :  { %234 = vrot.lane.b32.xlu2 %v227_v38, %s1143_s0  ;;  %v229_v50 = vrot.slane %v227_v38, 4 }
  0x7a   :  { %v39_v39 = vpop.permute.xlu0 %38 }
  0x7b   :  { %v41_v40 = vadd.f32 %v39_v39, %v1170_v1 }
  0x7d   :  { %v42_v41 = vmax.f32 %v41_v40, 1e-30  ;;  %vm53_vm7 = vcmp.gt.f32.partialorder %v41_v40, 0.0 }
  0x7f   :  { %1074 = vrsqrt.f32 %v42_v41  ;;  %vm49_vm5 = vweird.f32 %v42_v41 }
  0x85   :  { %v1075_v42 = vpop.eup %1074 }
  0x86   :  { %v44_v36 = vmul.f32 %v1075_v42, %v42_v41  ;;  %vm50_vm4 = vweird.f32 %v1075_v42 }
  0x87   :  { %vm51_vm6 = vmor %vm49_vm5, %vm50_vm4 }
  0x88   :  { %v45_v43 = vmul.f32 %v1075_v42, %v44_v36 }
  0x8a   :  { %v46_v44 = vmul.f32 0.5, %v45_v43 }
  0x8c   :  { %v47_v45 = vsub.f32 1.5, %v46_v44 }
  0x8e   :  { %v48_v46 = vmul.f32 %v1075_v42, %v47_v45 }
  0x90   :  { %v52_v6 = vsel %vm51_vm6, %v1075_v42, %v48_v46 }
  0x91   :  { %57 = vrot.lane.b32.xlu0 %v52_v6, %s1144_s15  ;;  %v54_v47 = vmul.f32 %v52_v6, %v1166_v0 }
  0x93   :  { %v55_v48 = vsel %vm53_vm7, %v54_v47, 1.0 }
  0xc7   :  { %v235_v51 = vpop.permute.xlu2 %234 }
  0xc8   :  { %v240_v34 = vmul.f32 %v235_v51, %v55_v48 }
 0x103   :  { %v58_v1 = vpop.permute.xlu0 %57 }
 0x104   :  { %v60_v49 = vmul.f32 %v58_v1, %v1166_v0 }
 0x106   :  { %62 = vrot.lane.b32.xlu1 %v60_v49, %s1135_s14 }
 0x10e   :  { %230 = vrot.lane.b32.xlu1 %v229_v50, %s1143_s0 }
 0x178   :  { %v63_v16 = vpop.permute.xlu1 %62 }
 0x179   :  { %v65_v52 = vsel %vm53_vm7, %v63_v16, 0.0 }
 0x17a   :  { %v237_v54 = vmul.f32 %v235_v51, %v65_v52 }
 0x180   :  { %v231_v53 = vpop.permute.xlu1 %230 }
 0x181   :  { %v233_v55 = vmul.f32 %v231_v53, %v55_v48  ;;  %v239_v56 = vmul.f32 %v231_v53, %v65_v52 }
 0x183   :  { %v1246_v57 = vsub.f32 %v233_v55, %v237_v54  ;;  %v1248_v58 = vadd.f32 %v240_v34, %v239_v56 }
 0x185   :  { %257 = vperm.xlu1 %1071, %v1248_v58   ;;  %251 = vperm.xlu0 %1070, %v1246_v57   ;;  %v242_v59 = vmul.f32 -1.0, %v1248_v58 }
 0x187   :  { %v243_v60 = vmul.f32 0.1, %v242_v59 }
 0x189   :  { %245 = vrot.lane.b32.xlu2 %v243_v60, %s1145_s16 }
 0x1e3   :  { %v246_v62 = vpop.permute.xlu2 %245 }
 0x1e4   :  { %v248_v63 = vadd.f32 %v246_v62, %v1166_v0  ;;  %v1267_v0 = vperm.slane %v26_v2, 3 }
 0x1e6   :  { %264 = vperm.xlu2 %1072, %v248_v63  }
 0x1f7   :  { %v258_v7 = vpop.permute.xlu1 %257  ;;  %v252_v8 = vpop.permute.xlu0 %251 }
 0x1f8   :  { %v260_v10 = vmul.f32 %v258_v7, %v1259_v3  ;;  %v254_v11 = vmul.f32 %v252_v8, %v1261_v4 }
 0x1fa   :  { %v261_v14 = vadd.f32 %v260_v10, %v254_v11 }
 0x240   :  { %v265_v13 = vpop.permute.xlu2 %264 }
 0x241   :  { %v267_v15 = vmul.f32 %v265_v13, %v1265_v12 }
 0x243   :  { %v268_v17 = vadd.f32 %v267_v15, %v261_v14 }
 0x245   :  { %v269_v19 = vadd.f32 %v268_v17, %v1267_v0 }
 0x247   :  { %v270_v27 = vmax.f32 %v269_v19, 0.0 }
 0x249   :  { %v288_v9 = vmul.f32 %v270_v27, %v1271_v21  ;;  %v278_v28 = vmul.f32 %v270_v27, %v1273_v23  ;;  %v271_v29 = vmul.f32 %v270_v27, %v1275_v25 }
 0x24b   :  { %v289_v30 = vsel %vm272_vm8, %v288_v9, 0.0  ;;  %v279_v31 = vsel %vm272_vm8, %v278_v28, 0.0  ;;  %v273_v33 = vsel %vm272_vm8, %v271_v29, 0.0 }
 0x24c   :  { %290 = vadd.xlane.f32.xlu1 %v289_v30  ;;  %280 = vadd.xlane.f32.xlu0 %v279_v31 }
 0x24d   :  { %274 = vadd.xlane.f32.xlu2 %v273_v33 }
 0x265   :  { %284 = vrot.lane.b32.xlu2 %v1283_v35, %s1135_s14 }
 0x2bf   :  { %v291_v37 = vpop.xlane.xlu1 %290 }
 0x2c0   :  { %v292_v38 = vadd.f32 %v291_v37, %v248_v63 }
 0x2c2   :  { %v1288_v39 = vadd.f32 %v292_v38, %v1283_v35 }
 0x2c4   :  { %v313_v40 = vmul.f32 0.1, %v1288_v39 }
 0x2c6   :  { %v314_v41 = vadd.f32 1.5707964, %v313_v40 }
 0x2c8   :  { %v316_v42 = vrot.slane %v314_v41, 4 }
 0x2ca   :  { %v1292_v36 = vsel %vm71_vm0, %v313_v40, %v316_v42 }
 0x2cb   :  { %v322_v43 = vand.u32 2139095040, %v1292_v36  ;;  %v319_v46 = vand.u32 2147483647, %v1292_v36  ;;  %vm321_vm6 = vcmp.lt.s32.totalorder %v1292_v36, 0 }
 0x2cd   :  { %v323_v44 = vshrl.u32 %v322_v43, 23  ;;  %v326_v47 = vand.u32 8388607, %v319_v46  ;;  %vm320_vm7 = vcmp.le.f32.partialorder %v319_v46, 0.7853982 }
 0x2cf   :  { %v1047_v45 = vadd.s32 4294967169, %v323_v44  ;;  %v327_v50 = vor.u32 8388608, %v326_v47 }
 0x2d1   :  { %v329_v6 = vadd.s32 1, %v1047_v45  ;;  %v1311_v11 = vshll.u32 %v327_v50, 8 }
 0x2d3   :  { %vm330_vm9 = vcmp.gt.s32.totalorder %v329_v6, 0  ;;  %v368_v29 = vand.u32 65535, %v1311_v11  ;;  %v369_v30 = vshrl.u32 %v1311_v11, 16 }
 0x2d4   :  { %v331_v48 = vsel %vm330_vm9, %v329_v6, 0 }
 0x2d5   :  { %v333_v1 = vand.u32 31, %v331_v48  ;;  %v1298_v16 = vshrl.u32 %v331_v48, 5 }
 0x2d7   :  { %v334_v49 = vsub.s32 32, %v333_v1  ;;  %v336_v51 = vshll.u32 %v1137_v18, %v333_v1  ;;  %v339_v52 = vshll.u32 %v1138_v20, %v333_v1  ;;  %v342_v34 = vshll.u32 %v1139_v22, %v333_v1 }
 0x2d8   :  { %v345_v56 = vshll.u32 %v1140_v24, %v333_v1  ;;  %v348_v60 = vshll.u32 %v1141_v26, %v333_v1  ;;  %vm351_vm10 = vcmp.lt.s32.totalorder %v1298_v16, 1  ;;  %vm354_vm11 = vcmp.lt.s32.totalorder %v1298_v16, 4 }
 0x2d9   :  { %v337_v53 = vshrl.u32 %v1138_v20, %v334_v49  ;;  %v340_v54 = vshrl.u32 %v1139_v22, %v334_v49  ;;  %v343_v55 = vshrl.u32 %v1140_v24, %v334_v49  ;;  %v346_v59 = vshrl.u32 %v1141_v26, %v334_v49 }
 0x2da   :  { %v349_v62 = vshrl.u32 %v1142_v32, %v334_v49  ;;  %vm353_vm12 = vcmp.lt.s32.totalorder %v1298_v16, 3  ;;  %vm352_vm13 = vcmp.lt.s32.totalorder %v1298_v16, 2 }
 0x2db   :  { %v338_v63 = vor.u32 %v337_v53, %v336_v51  ;;  %v341_v2 = vor.u32 %v340_v54, %v339_v52  ;;  %v344_v7 = vor.u32 %v343_v55, %v342_v34  ;;  %v347_v8 = vor.u32 %v346_v59, %v345_v56 }
 0x2dc   :  { %v350_v10 = vor.u32 %v349_v62, %v348_v60  ;;  %v335_v62 = vshrl.u32 %v1137_v18, %v334_v49 }
 0x2dd   :  { %v359_v13 = vsel %vm351_vm10, %v338_v63, %v341_v2  ;;  %v363_v14 = vsel %vm351_vm10, %v341_v2, %v344_v7  ;;  %v360_v15 = vsel %vm354_vm11, %v347_v8, 920167782  ;;  %v356_v56 = vsel %vm354_vm11, %v344_v7, 2102212464 }
 0x2de   :  { %v364_v17 = vsel %vm354_vm11, %v350_v10, 1326507024  ;;  %v361_v19 = vsel %vm353_vm12, %v344_v7, %v360_v15 }
 0x2df   :  { %v365_v27 = vsel %vm353_vm12, %v347_v8, %v364_v17  ;;  %v362_v9 = vsel %vm352_vm13, %v359_v13, %v361_v19  ;;  %v355_v17 = vsel %vm351_vm10, %v335_v62, %v338_v63  ;;  %v357_v19 = vsel %vm353_vm12, %v341_v2, %v356_v56 }
 0x2e0   :  { %v366_v28 = vsel %vm352_vm13, %v363_v14, %v365_v27  ;;  %v392_v37 = vand.u32 65535, %v362_v9  ;;  %v393_v38 = vshrl.u32 %v362_v9, 16  ;;  %v358_v49 = vsel %vm352_vm13, %v355_v17, %v357_v19 }
 0x2e1   :  { %v370_v31 = vand.u32 65535, %v366_v28  ;;  %v371_v33 = vshrl.u32 %v366_v28, 16  ;;  %vm462_vm12 = vweird.f32 %v1292_v36 }
 0x2e2   :  { %v395_v42 = vmul.u32 %v393_v38, %v368_v29  ;;  %v396_v43 = vmul.u32 %v392_v37, %v369_v30  ;;  %v394_v47 = vmul.u32 %v392_v37, %v368_v29  ;;  %v397_v51 = vmul.u32 %v393_v38, %v369_v30 }
 0x2e3   :  { %v373_v40 = vmul.u32 %v371_v33, %v368_v29  ;;  %v374_v41 = vmul.u32 %v370_v31, %v369_v30  ;;  %v372_v44 = vmul.u32 %v370_v31, %v368_v29  ;;  %v375_v6 = vmul.u32 %v371_v33, %v369_v30 }
 0x2e4   :  { %v398_v48 = vshll.u32 %v395_v42, 16  ;;  %v400_v53 = vshll.u32 %v396_v43, 16  ;;  %v399_v14 = vshrl.u32 %v395_v42, 16  ;;  %v401_v9 = vshrl.u32 %v396_v43, 16 }
 0x2e5   :  { %v376_v45 = vshll.u32 %v373_v40, 16  ;;  %v378_v1 = vshll.u32 %v374_v41, 16  ;;  %v377_v8 = vshrl.u32 %v373_v40, 16  ;;  %v379_v27 = vshrl.u32 %v374_v41, 16 }
 0x2e6   :  { %vm402_vm15 = vc.u32 %v394_v47, %v398_v48  ;;  %v404_v54 = vadd.s32 %v398_v48, %v394_v47  ;;  %v412_v37 = vmul.u32 %v1311_v11, %v358_v49 }
 0x2e7   :  { %vm380_vm14 = vc.u32 %v372_v44, %v376_v45  ;;  %v382_v50 = vadd.s32 %v376_v45, %v372_v44  ;;  %v403_v55 = vsel %vm402_vm15, 1, %v1136_v5 }
 0x2e8   :  { %v381_v52 = vsel %vm380_vm14, 1, %v1136_v5  ;;  %v405_v60 = vadd.s32 %v403_v55, %v397_v51  ;;  %vm406_vm2 = vc.u32 %v404_v54, %v400_v53  ;;  %v408_v30 = vadd.s32 %v404_v54, %v400_v53 }
 0x2e9   :  { %v383_v34 = vadd.s32 %v381_v52, %v375_v6  ;;  %vm384_vm1 = vc.u32 %v382_v50, %v378_v1  ;;  %v407_v13 = vsel %vm406_vm2, 1, %v1136_v5 }
 0x2ea   :  { %v385_v59 = vsel %vm384_vm1, 1, %v1136_v5  ;;  %v409_v15 = vadd.s32 %v407_v13, %v405_v60 }
 0x2eb   :  { %v387_v10 = vadd.s32 %v385_v59, %v383_v34 }
 0x2ec   :  { %v410_v28 = vadd.s32 %v409_v15, %v399_v14 }
 0x2ed   :  { %v388_v7 = vadd.s32 %v387_v10, %v377_v8 }
 0x2ee   :  { %v411_v31 = vadd.s32 %v410_v28, %v401_v9 }
 0x2ef   :  { %v389_v29 = vadd.s32 %v388_v7, %v379_v27 }
 0x2f0   :  { %v415_v33 = vadd.s32 1, %v411_v31 }
 0x2f1   :  { %vm414_vm3 = vc.u32 %v389_v29, %v408_v30  ;;  %v413_v16 = vadd.s32 %v408_v30, %v389_v29 }
 0x2f2   :  { %v416_v38 = vsel %vm414_vm3, %v415_v33, %v411_v31 }
 0x2f3   :  { %v417_v40 = vadd.s32 %v416_v38, %v412_v37 }
 0x2f5   :  { %v418_v63 = vadd.s32 536870912, %v417_v40 }
 0x2f7   :  { %v419_v42 = vshrl.u32 %v418_v63, 30 }
 0x2f9   :  { %v420_v44 = vshll.u32 %v419_v42, 30  ;;  %v443_v62 = vsub.s32 4, %v419_v42 }
 0x2fb   :  { %v421_v2 = vsub.s32 %v417_v40, %v420_v44  ;;  %v444_v15 = vsel %vm321_vm6, %v443_v62, %v419_v42 }
 0x2fc   :  { %v446_v27 = vsel %vm320_vm7, 0, %v444_v15 }
 0x2fd   :  { %vm422_vm4 = vcmp.lt.s32.totalorder %v421_v2, 0  ;;  %v423_v41 = vsub.s32 0, %v421_v2  ;;  %v463_v30 = vadd.s32 3, %v446_v27 }
 0x2ff   :  { %v424_v43 = vsel %vm422_vm4, %v423_v41, %v421_v2  ;;  %v464_v37 = vand.u32 3, %v463_v30 }
 0x300   :  { %v425_v45 = vclz %v424_v43 }
 0x301   :  { %vm466_vm9 = vcmp.eq.s32.totalorder %v464_v37, 0  ;;  %vm469_vm10 = vcmp.eq.s32.totalorder %v464_v37, 2  ;;  %vm465_vm11 = vcmp.lt.s32.totalorder %v464_v37, 2 }
 0x302   :  { %v1048_v6 = vadd.s32 4294967294, %v425_v45  ;;  %v275_v45 = vpop.xlane.xlu2 %274 }
 0x304   :  { %vm1049_vm5 = vcmp.lt.s32.totalorder %v1048_v6, 0 }
 0x305   :  { %v428_v47 = vsel %vm1049_vm5, 0, %v1048_v6  ;;  %v281_v6 = vpop.xlane.xlu0 %280 }
 0x306   :  { %v429_v48 = vsub.s32 32, %v428_v47  ;;  %v433_v1 = vsub.s32 4294967266, %v428_v47  ;;  %v430_v50 = vshll.u32 %v421_v2, %v428_v47 }
 0x308   :  { %v431_v51 = vshrl.u32 %v413_v16, %v429_v48  ;;  %v434_v52 = vadd.s32 127, %v433_v1  ;;  %v282_v16 = vadd.f32 %v281_v6, %v1248_v58  ;;  %v276_v48 = vadd.f32 %v275_v45, %v1246_v57 }
 0x30a   :  { %v432_v11 = vor.u32 %v431_v51, %v430_v50  ;;  %v435_v53 = vshll.u32 %v434_v52, 23  ;;  %v1355_v47 = vpop.permute.xlu2 %284  ;;  %v277_v50 = vadd.f32 %v276_v48, %v1283_v35 }
 0x30b   :  { %v287_v1 = vadd.f32 %v1355_v47, %v282_v16 }
 0x30c   :  { %v436_v54 = vor.u32 4788187, %v435_v53  ;;  %v439_v55 = vcvt.s32.f32 %v432_v11  ;;  %v294_v51 = vmul.f32 %v277_v50, %v277_v50 }
 0x30e   :  { %v437_v34 = vand.u32 2147483647, %v436_v54 }
 0x310   :  { %v440_v56 = vmul.f32 %v439_v55, %v437_v34 }
 0x312   :  { %v441_v59 = vxor.u32 2147483648, %v440_v56 }
 0x314   :  { %v442_v60 = vsel %vm321_vm6, %v441_v59, %v440_v56 }
 0x315   :  { %v445_v8 = vsel %vm320_vm7, %v1292_v36, %v442_v60  ;;  %v295_v36 = vmul.f32 %v287_v1, %v287_v1 }
 0x316   :  { %v447_v10 = vmul.f32 %v445_v8, %v445_v8 }
 0x317   :  { %v296_v52 = vadd.f32 %v295_v36, %v294_v51 }
 0x318   :  { %v448_v13 = vmul.f32 -0.001358992, %v447_v10  ;;  %v455_v14 = vmul.f32 -0.00019511016, %v447_v10 }
 0x319   :  { %v297_v11 = vmax.f32 %v296_v52, 1e-30  ;;  %vm308_vm1 = vcmp.gt.f32.partialorder %v296_v52, 0.0 }
 0x31a   :  { %v449_v17 = vadd.f32 0.041655596, %v448_v13  ;;  %v456_v19 = vadd.f32 0.008332121, %v455_v14 }
 0x31b   :  { %1076 = vrsqrt.f32 %v297_v11  ;;  %vm304_vm14 = vweird.f32 %v297_v11 }
 0x31c   :  { %v450_v7 = vmul.f32 %v449_v17, %v447_v10  ;;  %v457_v9 = vmul.f32 %v456_v19, %v447_v10 }
 0x31e   :  { %v451_v28 = vadd.f32 -0.4999988, %v450_v7  ;;  %v458_v29 = vadd.f32 -0.16666654, %v457_v9 }
 0x320   :  { %v452_v49 = vmul.f32 %v451_v28, %v447_v10  ;;  %v459_v31 = vmul.f32 %v458_v29, %v447_v10 }
 0x321   :  { %v1077_v53 = vpop.eup %1076 }
 0x322   :  { %v453_v33 = vadd.f32 1.0, %v452_v49  ;;  %v460_v46 = vadd.f32 1.0, %v459_v31  ;;  %v299_v54 = vmul.f32 %v1077_v53, %v297_v11  ;;  %vm305_vm13 = vweird.f32 %v1077_v53 }
 0x323   :  { %vm306_vm15 = vmor %vm304_vm14, %vm305_vm13 }
 0x324   :  { %v461_v38 = vmul.f32 %v460_v46, %v445_v8  ;;  %v470_v40 = vxor.u32 2147483648, %v453_v33  ;;  %v300_v34 = vmul.f32 %v1077_v53, %v299_v54 }
 0x326   :  { %v467_v63 = vxor.u32 2147483648, %v461_v38  ;;  %v471_v44 = vsel %vm469_vm10, %v470_v40, %v461_v38  ;;  %v301_v55 = vmul.f32 0.5, %v300_v34 }
 0x328   :  { %v468_v42 = vsel %vm466_vm9, %v453_v33, %v467_v63  ;;  %v302_v56 = vsub.f32 1.5, %v301_v55 }
 0x329   :  { %v472_v2 = vsel %vm465_vm11, %v468_v42, %v471_v44 }
 0x32a   :  { %v473_v41 = vsel %vm462_vm12, nan, %v472_v2  ;;  %v303_v59 = vmul.f32 %v1077_v53, %v302_v56 }
 0x32b   :  { %v475_v43 = vrot.slane %v473_v41, 4  ;;  %480 = vrot.lane.b32.xlu0 %v473_v41, %s1143_s0 }
 0x32c   :  { %v307_v58 = vsel %vm306_vm15, %v1077_v53, %v303_v59 }
 0x32d   :  { %476 = vrot.lane.b32.xlu1 %v475_v43, %s1143_s0  ;;  %v309_v57 = vmul.f32 %v307_v58, %v277_v50  ;;  %v311_v60 = vmul.f32 %v307_v58, %v287_v1 }
 0x32f   :  { %v310_v8 = vsel %vm308_vm1, %v309_v57, 1.0  ;;  %v312_v10 = vsel %vm308_vm1, %v311_v60, 0.0 }
 0x39d   :  { %v481_v62 = vpop.permute.xlu0 %480 }
 0x39e   :  { %v483_v14 = vmul.f32 %v481_v62, %v312_v10  ;;  %v486_v15 = vmul.f32 %v481_v62, %v310_v8 }
 0x39f   :  { %v477_v13 = vpop.permute.xlu1 %476 }
 0x3a0   :  { %v479_v17 = vmul.f32 %v477_v13, %v310_v8  ;;  %v485_v19 = vmul.f32 %v477_v13, %v312_v10 }
 0x3a2   :  { %v1361_v27 = vsub.f32 %v479_v17, %v483_v14  ;;  %v1363_v7 = vadd.f32 %v486_v15, %v485_v19 }
 0x3a4   :  { %503 = vperm.xlu0 %1070, %v1363_v7   ;;  %497 = vperm.xlu1 %1071, %v1361_v27   ;;  %v488_v9 = vmul.f32 -1.0, %v1363_v7 }
 0x3a6   :  { %v489_v28 = vmul.f32 0.1, %v488_v9 }
 0x3a8   :  { %491 = vrot.lane.b32.xlu2 %v489_v28, %s1145_s16 }
 0x402   :  { %v492_v29 = vpop.permute.xlu2 %491 }
 0x403   :  { %v494_v30 = vadd.f32 %v492_v29, %v1288_v39 }
 0x405   :  { %510 = vperm.xlu2 %1072, %v494_v30  }
 0x416   :  { %v504_v49 = vpop.permute.xlu0 %503  ;;  %v498_v31 = vpop.permute.xlu1 %497 }
 0x417   :  { %v506_v33 = vmul.f32 %v504_v49, %v1259_v3  ;;  %v500_v46 = vmul.f32 %v498_v31, %v1261_v4 }
 0x419   :  { %v507_v38 = vadd.f32 %v506_v33, %v500_v46 }
 0x45f   :  { %v511_v37 = vpop.permute.xlu2 %510 }
 0x460   :  { %v513_v40 = vmul.f32 %v511_v37, %v1265_v12 }
 0x462   :  { %v514_v63 = vadd.f32 %v513_v40, %v507_v38 }
 0x464   :  { %v515_v42 = vadd.f32 %v514_v63, %v1267_v0 }
 0x466   :  { %v516_v44 = vmax.f32 %v515_v42, 0.0 }
 0x468   :  { %v529_v2 = vmul.f32 %v516_v44, %v1271_v21  ;;  %v523_v41 = vmul.f32 %v516_v44, %v1273_v23  ;;  %v517_v39 = vmul.f32 %v516_v44, %v1275_v25 }
 0x46a   :  { %v530_v43 = vsel %vm272_vm8, %v529_v2, 0.0  ;;  %v524_v45 = vsel %vm272_vm8, %v523_v41, 0.0  ;;  %v518_v6 = vsel %vm272_vm8, %v517_v39, 0.0 }
 0x46b   :  { %531 = vadd.xlane.f32.xlu1 %v530_v43  ;;  %525 = vadd.xlane.f32.xlu2 %v524_v45 }
 0x46c   :  { %519 = vadd.xlane.f32.xlu0 %v518_v6 }
 0x4de   :  { %v532_v16 = vpop.xlane.xlu1 %531 }
 0x4df   :  { %v533_v48 = vadd.f32 %v532_v16, %v494_v30 }
 0x4e1   :  { %v1381_v1 = vadd.f32 %v533_v48, %v1283_v35 }
 0x4e3   :  { %v554_v50 = vmul.f32 0.1, %v1381_v1 }
 0x4e5   :  { %v555_v36 = vadd.f32 1.5707964, %v554_v50 }
 0x4e7   :  { %v557_v51 = vrot.slane %v555_v36, 4 }
 0x4e9   :  { %v1385_v52 = vsel %vm71_vm0, %v554_v50, %v557_v51 }
 0x4ea   :  { %v563_v11 = vand.u32 2139095040, %v1385_v52  ;;  %v560_v54 = vand.u32 2147483647, %v1385_v52  ;;  %vm562_vm15 = vcmp.lt.s32.totalorder %v1385_v52, 0 }
 0x4ec   :  { %v564_v53 = vshrl.u32 %v563_v11, 23  ;;  %v567_v56 = vand.u32 8388607, %v560_v54  ;;  %vm561_vm1 = vcmp.le.f32.partialorder %v560_v54, 0.7853982 }
 0x4ee   :  { %v1050_v34 = vadd.s32 4294967169, %v564_v53  ;;  %v568_v57 = vor.u32 8388608, %v567_v56 }
 0x4f0   :  { %v570_v55 = vadd.s32 1, %v1050_v34  ;;  %v1403_v31 = vshll.u32 %v568_v57, 8 }
 0x4f2   :  { %vm571_vm2 = vcmp.gt.s32.totalorder %v570_v55, 0  ;;  %v609_v43 = vand.u32 65535, %v1403_v31  ;;  %v610_v45 = vshrl.u32 %v1403_v31, 16 }
 0x4f3   :  { %v572_v59 = vsel %vm571_vm2, %v570_v55, 0 }
 0x4f4   :  { %v574_v58 = vand.u32 31, %v572_v59  ;;  %v1391_v62 = vshrl.u32 %v572_v59, 5 }
 0x4f6   :  { %v575_v60 = vsub.s32 32, %v574_v58  ;;  %v577_v8 = vshll.u32 %v1137_v18, %v574_v58  ;;  %v580_v10 = vshll.u32 %v1138_v20, %v574_v58  ;;  %v583_v15 = vshll.u32 %v1139_v22, %v574_v58 }
 0x4f7   :  { %v586_v17 = vshll.u32 %v1140_v24, %v574_v58  ;;  %v589_v28 = vshll.u32 %v1141_v26, %v574_v58  ;;  %vm592_vm3 = vcmp.lt.s32.totalorder %v1391_v62, 1  ;;  %vm595_vm4 = vcmp.lt.s32.totalorder %v1391_v62, 4 }
 0x4f8   :  { %v578_v13 = vshrl.u32 %v1138_v20, %v575_v60  ;;  %v581_v14 = vshrl.u32 %v1139_v22, %v575_v60  ;;  %v584_v19 = vshrl.u32 %v1140_v24, %v575_v60  ;;  %v587_v9 = vshrl.u32 %v1141_v26, %v575_v60 }
 0x4f9   :  { %v590_v29 = vshrl.u32 %v1142_v32, %v575_v60  ;;  %vm594_vm5 = vcmp.lt.s32.totalorder %v1391_v62, 3  ;;  %vm593_vm6 = vcmp.lt.s32.totalorder %v1391_v62, 2 }
 0x4fa   :  { %v579_v30 = vor.u32 %v578_v13, %v577_v8  ;;  %v582_v49 = vor.u32 %v581_v14, %v580_v10  ;;  %v585_v33 = vor.u32 %v584_v19, %v583_v15  ;;  %v588_v46 = vor.u32 %v587_v9, %v586_v17 }
 0x4fb   :  { %v591_v37 = vor.u32 %v590_v29, %v589_v28 }
 0x4fc   :  { %v600_v38 = vsel %vm592_vm3, %v579_v30, %v582_v49  ;;  %v601_v40 = vsel %vm595_vm4, %v588_v46, 920167782  ;;  %v604_v63 = vsel %vm592_vm3, %v582_v49, %v585_v33  ;;  %v597_v9 = vsel %vm595_vm4, %v585_v33, 2102212464 }
 0x4fd   :  { %v605_v42 = vsel %vm595_vm4, %v591_v37, 1326507024  ;;  %v602_v44 = vsel %vm594_vm5, %v585_v33, %v601_v40 }
 0x4fe   :  { %v606_v2 = vsel %vm594_vm5, %v588_v46, %v605_v42  ;;  %v603_v41 = vsel %vm593_vm6, %v600_v38, %v602_v44  ;;  %v576_v46 = vshrl.u32 %v1137_v18, %v575_v60 }
 0x4ff   :  { %v607_v39 = vsel %vm593_vm6, %v604_v63, %v606_v2  ;;  %v633_v48 = vand.u32 65535, %v603_v41  ;;  %v634_v50 = vshrl.u32 %v603_v41, 16  ;;  %v598_v2 = vsel %vm594_vm5, %v582_v49, %v597_v9 }
 0x500   :  { %v611_v6 = vand.u32 65535, %v607_v39  ;;  %v612_v16 = vshrl.u32 %v607_v39, 16  ;;  %v596_v44 = vsel %vm592_vm3, %v576_v46, %v579_v30  ;;  %vm703_vm5 = vweird.f32 %v1385_v52 }
 0x501   :  { %v636_v11 = vmul.u32 %v634_v50, %v609_v43  ;;  %v637_v53 = vmul.u32 %v633_v48, %v610_v45  ;;  %v635_v59 = vmul.u32 %v633_v48, %v609_v43  ;;  %v638_v10 = vmul.u32 %v634_v50, %v610_v45 }
 0x502   :  { %v614_v36 = vmul.u32 %v612_v16, %v609_v43  ;;  %v615_v51 = vmul.u32 %v611_v6, %v610_v45  ;;  %v613_v34 = vmul.u32 %v611_v6, %v609_v43  ;;  %v616_v56 = vmul.u32 %v612_v16, %v610_v45 }
 0x503   :  { %v639_v58 = vshll.u32 %v636_v11, 16  ;;  %v641_v14 = vshll.u32 %v637_v53, 16  ;;  %v640_v63 = vshrl.u32 %v636_v11, 16  ;;  %v642_v39 = vshrl.u32 %v637_v53, 16 }
 0x504   :  { %v617_v55 = vshll.u32 %v614_v36, 16  ;;  %v619_v57 = vshll.u32 %v615_v51, 16  ;;  %v618_v37 = vshrl.u32 %v614_v36, 16  ;;  %v620_v41 = vshrl.u32 %v615_v51, 16 }
 0x505   :  { %vm643_vm9 = vc.u32 %v635_v59, %v639_v58  ;;  %v645_v15 = vadd.s32 %v639_v58, %v635_v59  ;;  %v599_v60 = vsel %vm593_vm6, %v596_v44, %v598_v2 }
 0x506   :  { %vm621_vm7 = vc.u32 %v613_v34, %v617_v55  ;;  %v623_v8 = vadd.s32 %v617_v55, %v613_v34  ;;  %v644_v19 = vsel %vm643_vm9, 1, %v1136_v5  ;;  %v653_v50 = vmul.u32 %v1403_v31, %v599_v60 }
 0x507   :  { %v622_v13 = vsel %vm621_vm7, 1, %v1136_v5  ;;  %v646_v29 = vadd.s32 %v644_v19, %v638_v10  ;;  %vm647_vm11 = vc.u32 %v645_v15, %v641_v14  ;;  %v649_v6 = vadd.s32 %v645_v15, %v641_v14 }
 0x508   :  { %v624_v17 = vadd.s32 %v622_v13, %v616_v56  ;;  %vm625_vm10 = vc.u32 %v623_v8, %v619_v57  ;;  %v648_v40 = vsel %vm647_vm11, 1, %v1136_v5 }
 0x509   :  { %v626_v28 = vsel %vm625_vm10, 1, %v1136_v5  ;;  %v650_v42 = vadd.s32 %v648_v40, %v646_v29 }
 0x50a   :  { %v628_v38 = vadd.s32 %v626_v28, %v624_v17 }
 0x50b   :  { %v651_v43 = vadd.s32 %v650_v42, %v640_v63 }
 0x50c   :  { %v629_v33 = vadd.s32 %v628_v38, %v618_v37 }
 0x50d   :  { %v652_v16 = vadd.s32 %v651_v43, %v642_v39 }
 0x50e   :  { %v630_v45 = vadd.s32 %v629_v33, %v620_v41 }
 0x50f   :  { %v656_v48 = vadd.s32 1, %v652_v16 }
 0x510   :  { %vm655_vm12 = vc.u32 %v630_v45, %v649_v6  ;;  %v654_v62 = vadd.s32 %v649_v6, %v630_v45 }
 0x511   :  { %v657_v36 = vsel %vm655_vm12, %v656_v48, %v652_v16 }
 0x512   :  { %v658_v11 = vadd.s32 %v657_v36, %v653_v50 }
 0x514   :  { %v659_v30 = vadd.s32 536870912, %v658_v11 }
 0x516   :  { %v660_v34 = vshrl.u32 %v659_v30, 30 }
 0x518   :  { %v661_v55 = vshll.u32 %v660_v34, 30  ;;  %v684_v37 = vsub.s32 4, %v660_v34 }
 0x51a   :  { %v662_v49 = vsub.s32 %v658_v11, %v661_v55  ;;  %v685_v44 = vsel %vm562_vm15, %v684_v37, %v660_v34 }
 0x51b   :  { %v687_v33 = vsel %vm561_vm1, 0, %v685_v44 }
 0x51c   :  { %vm663_vm13 = vcmp.lt.s32.totalorder %v662_v49, 0  ;;  %v664_v51 = vsub.s32 0, %v662_v49  ;;  %v704_v60 = vadd.s32 3, %v687_v33 }
 0x51e   :  { %v665_v53 = vsel %vm663_vm13, %v664_v51, %v662_v49  ;;  %v705_v36 = vand.u32 3, %v704_v60 }
 0x51f   :  { %v666_v56 = vclz %v665_v53 }
 0x520   :  { %vm707_vm2 = vcmp.eq.s32.totalorder %v705_v36, 0  ;;  %vm710_vm3 = vcmp.eq.s32.totalorder %v705_v36, 2  ;;  %vm706_vm4 = vcmp.lt.s32.totalorder %v705_v36, 2 }
 0x521   :  { %v1051_v59 = vadd.s32 4294967294, %v666_v56 }
 0x523   :  { %vm1052_vm14 = vcmp.lt.s32.totalorder %v1051_v59, 0 }
 0x524   :  { %v669_v58 = vsel %vm1052_vm14, 0, %v1051_v59  ;;  %v526_v59 = vpop.xlane.xlu2 %525 }
 0x525   :  { %v670_v57 = vsub.s32 32, %v669_v58  ;;  %v674_v8 = vsub.s32 4294967266, %v669_v58  ;;  %v671_v10 = vshll.u32 %v662_v49, %v669_v58  ;;  %v520_v58 = vpop.xlane.xlu0 %519 }
 0x527   :  { %v672_v13 = vshrl.u32 %v654_v62, %v670_v57  ;;  %v675_v14 = vadd.s32 127, %v674_v8  ;;  %v527_v62 = vadd.f32 %v526_v59, %v1363_v7  ;;  %v521_v57 = vadd.f32 %v520_v58, %v1361_v27 }
 0x529   :  { %v673_v31 = vor.u32 %v672_v13, %v671_v10  ;;  %v676_v15 = vshll.u32 %v675_v14, 23  ;;  %v528_v8 = vadd.f32 %v527_v62, %v1355_v47  ;;  %v522_v10 = vadd.f32 %v521_v57, %v1283_v35 }
 0x52b   :  { %v677_v17 = vor.u32 4788187, %v676_v15  ;;  %v680_v9 = vcvt.s32.f32 %v673_v31  ;;  %v536_v13 = vmul.f32 %v528_v8, %v528_v8  ;;  %v535_v14 = vmul.f32 %v522_v10, %v522_v10 }
 0x52d   :  { %v678_v19 = vand.u32 2147483647, %v677_v17 }
 0x52f   :  { %v681_v28 = vmul.f32 %v680_v9, %v678_v19 }
 0x531   :  { %v682_v29 = vxor.u32 2147483648, %v681_v28 }
 0x533   :  { %v683_v46 = vsel %vm562_vm15, %v682_v29, %v681_v28 }
 0x534   :  { %v686_v38 = vsel %vm561_vm1, %v1385_v52, %v683_v46  ;;  %v537_v52 = vadd.f32 %v536_v13, %v535_v14 }
 0x535   :  { %v688_v40 = vmul.f32 %v686_v38, %v686_v38 }
 0x536   :  { %v538_v31 = vmax.f32 %v537_v52, 1e-30  ;;  %vm549_vm10 = vcmp.gt.f32.partialorder %v537_v52, 0.0 }
 0x537   :  { %v689_v63 = vmul.f32 -0.001358992, %v688_v40  ;;  %v696_v42 = vmul.f32 -0.00019511016, %v688_v40 }
 0x538   :  { %1078 = vrsqrt.f32 %v538_v31  ;;  %vm545_vm7 = vweird.f32 %v538_v31 }
 0x539   :  { %v690_v2 = vadd.f32 0.041655596, %v689_v63  ;;  %v697_v41 = vadd.f32 0.008332121, %v696_v42 }
 0x53b   :  { %v691_v39 = vmul.f32 %v690_v2, %v688_v40  ;;  %v698_v43 = vmul.f32 %v697_v41, %v688_v40 }
 0x53d   :  { %v692_v45 = vadd.f32 -0.4999988, %v691_v39  ;;  %v699_v6 = vadd.f32 -0.16666654, %v698_v43 }
 0x53e   :  { %v1079_v15 = vpop.eup %1078 }
 0x53f   :  { %v693_v16 = vmul.f32 %v692_v45, %v688_v40  ;;  %v700_v48 = vmul.f32 %v699_v6, %v688_v40  ;;  %v540_v17 = vmul.f32 %v1079_v15, %v538_v31  ;;  %vm546_vm6 = vweird.f32 %v1079_v15 }
 0x540   :  { %vm547_vm9 = vmor %vm545_vm7, %vm546_vm6 }
 0x541   :  { %v694_v50 = vadd.f32 1.0, %v693_v16  ;;  %v701_v54 = vadd.f32 1.0, %v700_v48  ;;  %v541_v19 = vmul.f32 %v1079_v15, %v540_v17 }
 0x543   :  { %v702_v11 = vmul.f32 %v701_v54, %v686_v38  ;;  %v711_v30 = vxor.u32 2147483648, %v694_v50  ;;  %v542_v9 = vmul.f32 0.5, %v541_v19 }
 0x545   :  { %v708_v55 = vxor.u32 2147483648, %v702_v11  ;;  %v712_v49 = vsel %vm710_vm3, %v711_v30, %v702_v11  ;;  %v543_v28 = vsub.f32 1.5, %v542_v9 }
 0x547   :  { %v709_v34 = vsel %vm707_vm2, %v694_v50, %v708_v55  ;;  %v544_v29 = vmul.f32 %v1079_v15, %v543_v28 }
 0x548   :  { %v713_v51 = vsel %vm706_vm4, %v709_v34, %v712_v49 }
 0x549   :  { %v714_v53 = vsel %vm703_vm5, nan, %v713_v51  ;;  %v548_v7 = vsel %vm547_vm9, %v1079_v15, %v544_v29 }
 0x54a   :  { %v716_v56 = vrot.slane %v714_v53, 4  ;;  %721 = vrot.lane.b32.xlu0 %v714_v53, %s1143_s0  ;;  %v550_v27 = vmul.f32 %v548_v7, %v522_v10  ;;  %v552_v46 = vmul.f32 %v548_v7, %v528_v8 }
 0x54c   :  { %717 = vrot.lane.b32.xlu1 %v716_v56, %s1143_s0  ;;  %v551_v38 = vsel %vm549_vm10, %v550_v27, 1.0  ;;  %v553_v40 = vsel %vm549_vm10, %v552_v46, 0.0 }
 0x5bc   :  { %v722_v37 = vpop.permute.xlu0 %721 }
 0x5bd   :  { %v724_v42 = vmul.f32 %v722_v37, %v553_v40  ;;  %v727_v44 = vmul.f32 %v722_v37, %v551_v38 }
 0x5be   :  { %v718_v63 = vpop.permute.xlu1 %717 }
 0x5bf   :  { %v720_v2 = vmul.f32 %v718_v63, %v551_v38  ;;  %v726_v41 = vmul.f32 %v718_v63, %v553_v40 }
 0x5c1   :  { %v1452_v33 = vsub.f32 %v720_v2, %v724_v42  ;;  %v1454_v39 = vadd.f32 %v727_v44, %v726_v41 }
 0x5c3   :  { %744 = vperm.xlu1 %1071, %v1454_v39   ;;  %738 = vperm.xlu0 %1070, %v1452_v33   ;;  %v729_v43 = vmul.f32 -1.0, %v1454_v39 }
 0x5c5   :  { %v730_v45 = vmul.f32 0.1, %v729_v43 }
 0x5c7   :  { %732 = vrot.lane.b32.xlu2 %v730_v45, %s1145_s16 }
 0x621   :  { %v733_v6 = vpop.permute.xlu2 %732 }
 0x622   :  { %v735_v60 = vadd.f32 %v733_v6, %v1381_v1 }
 0x624   :  { %751 = vperm.xlu2 %1072, %v735_v60  }
 0x635   :  { %v745_v16 = vpop.permute.xlu1 %744  ;;  %v739_v48 = vpop.permute.xlu0 %738 }
 0x636   :  { %v747_v50 = vmul.f32 %v745_v16, %v1259_v3  ;;  %v741_v54 = vmul.f32 %v739_v48, %v1261_v4 }
 0x638   :  { %v748_v11 = vadd.f32 %v747_v50, %v741_v54 }
 0x67e   :  { %v752_v36 = vpop.permute.xlu2 %751 }
 0x67f   :  { %v754_v30 = vmul.f32 %v752_v36, %v1265_v12 }
 0x681   :  { %v755_v55 = vadd.f32 %v754_v30, %v748_v11 }
 0x683   :  { %v756_v34 = vadd.f32 %v755_v55, %v1267_v0 }
 0x685   :  { %v757_v49 = vmax.f32 %v756_v34, 0.0 }
 0x687   :  { %v770_v51 = vmul.f32 %v757_v49, %v1271_v21  ;;  %v764_v53 = vmul.f32 %v757_v49, %v1273_v23  ;;  %v758_v1 = vmul.f32 %v757_v49, %v1275_v25 }
 0x689   :  { %v771_v56 = vsel %vm272_vm8, %v770_v51, 0.0  ;;  %v765_v59 = vsel %vm272_vm8, %v764_v53, 0.0  ;;  %v759_v58 = vsel %vm272_vm8, %v758_v1, 0.0 }
 0x68a   :  { %772 = vadd.xlane.f32.xlu0 %v771_v56  ;;  %766 = vadd.xlane.f32.xlu2 %v765_v59 }
 0x68b   :  { %760 = vadd.xlane.f32.xlu1 %v759_v58 }
 0x6fd   :  { %v773_v62 = vpop.xlane.xlu0 %772 }
 0x6fe   :  { %v774_v57 = vadd.f32 %v773_v62, %v735_v60 }
 0x700   :  { %v1472_v8 = vadd.f32 %v774_v57, %v1283_v35 }
 0x702   :  { %v795_v10 = vmul.f32 0.1, %v1472_v8 }
 0x704   :  { %v796_v13 = vadd.f32 1.5707964, %v795_v10 }
 0x706   :  { %v798_v14 = vrot.slane %v796_v13, 4 }
 0x708   :  { %v1476_v52 = vsel %vm71_vm0, %v795_v10, %v798_v14 }
 0x709   :  { %v804_v31 = vand.u32 2139095040, %v1476_v52  ;;  %v801_v17 = vand.u32 2147483647, %v1476_v52  ;;  %vm803_vm7 = vcmp.lt.s32.totalorder %v1476_v52, 0 }
 0x70b   :  { %v805_v15 = vshrl.u32 %v804_v31, 23  ;;  %v808_v28 = vand.u32 8388607, %v801_v17  ;;  %vm802_vm9 = vcmp.le.f32.partialorder %v801_v17, 0.7853982 }
 0x70d   :  { %v1053_v19 = vadd.s32 4294967169, %v805_v15  ;;  %v809_v27 = vor.u32 8388608, %v808_v28 }
 0x70f   :  { %v811_v9 = vadd.s32 1, %v1053_v19  ;;  %v1494_v48 = vshll.u32 %v809_v27, 8 }
 0x711   :  { %vm812_vm11 = vcmp.gt.s32.totalorder %v811_v9, 0  ;;  %v850_v34 = vand.u32 65535, %v1494_v48  ;;  %v851_v49 = vshrl.u32 %v1494_v48, 16 }
 0x712   :  { %v813_v29 = vsel %vm812_vm11, %v811_v9, 0 }
 0x713   :  { %v815_v7 = vand.u32 31, %v813_v29  ;;  %v1482_v37 = vshrl.u32 %v813_v29, 5 }
 0x715   :  { %v816_v46 = vsub.s32 32, %v815_v7  ;;  %v818_v38 = vshll.u32 %v1137_v18, %v815_v7  ;;  %v821_v40 = vshll.u32 %v1138_v20, %v815_v7  ;;  %v824_v44 = vshll.u32 %v1139_v22, %v815_v7 }
 0x716   :  { %v827_v2 = vshll.u32 %v1140_v24, %v815_v7  ;;  %v830_v45 = vshll.u32 %v1141_v26, %v815_v7  ;;  %vm833_vm0 = vcmp.lt.s32.totalorder %v1482_v37, 1  ;;  %vm836_vm12 = vcmp.lt.s32.totalorder %v1482_v37, 4 }
 0x717   :  { %v819_v63 = vshrl.u32 %v1138_v20, %v816_v46  ;;  %v822_v42 = vshrl.u32 %v1139_v22, %v816_v46  ;;  %v825_v41 = vshrl.u32 %v1140_v24, %v816_v46  ;;  %v828_v43 = vshrl.u32 %v1141_v26, %v816_v46 }
 0x718   :  { %v831_v6 = vshrl.u32 %v1142_v32, %v816_v46  ;;  %vm835_vm13 = vcmp.lt.s32.totalorder %v1482_v37, 3  ;;  %vm834_vm14 = vcmp.lt.s32.totalorder %v1482_v37, 2 }
 0x719   :  { %v820_v60 = vor.u32 %v819_v63, %v818_v38  ;;  %v823_v16 = vor.u32 %v822_v42, %v821_v40  ;;  %v826_v50 = vor.u32 %v825_v41, %v824_v44  ;;  %v829_v20 = vor.u32 %v828_v43, %v827_v2 }
 0x71a   :  { %v832_v54 = vor.u32 %v831_v6, %v830_v45  ;;  %v817_v2 = vshrl.u32 %v1137_v18, %v816_v46 }
 0x71b   :  { %v841_v22 = vsel %vm833_vm0, %v820_v60, %v823_v16  ;;  %v842_v24 = vsel %vm836_vm12, %v829_v20, 920167782  ;;  %v845_v26 = vsel %vm833_vm0, %v823_v16, %v826_v50  ;;  %v838_v63 = vsel %vm836_vm12, %v826_v50, 2102212464 }
 0x71c   :  { %v846_v32 = vsel %vm836_vm12, %v832_v54, 1326507024  ;;  %v843_v36 = vsel %vm835_vm13, %v826_v50, %v842_v24  ;;  %v837_v54 = vsel %vm833_vm0, %v817_v2, %v820_v60  ;;  %vm944_vm12 = vweird.f32 %v1476_v52 }
 0x71d   :  { %v847_v11 = vsel %vm835_vm13, %v829_v20, %v846_v32  ;;  %v844_v30 = vsel %vm834_vm14, %v841_v22, %v843_v36  ;;  %v839_v22 = vsel %vm835_vm13, %v823_v16, %v838_v63 }
 0x71e   :  { %v848_v55 = vsel %vm834_vm14, %v845_v26, %v847_v11  ;;  %v874_v1 = vand.u32 65535, %v844_v30  ;;  %v875_v56 = vshrl.u32 %v844_v30, 16  ;;  %v840_v18 = vsel %vm834_vm14, %v837_v54, %v839_v22 }
 0x71f   :  { %v852_v51 = vand.u32 65535, %v848_v55  ;;  %v853_v53 = vshrl.u32 %v848_v55, 16  ;;  %v894_v30 = vmul.u32 %v1494_v48, %v840_v18 }
 0x720   :  { %v877_v62 = vmul.u32 %v875_v56, %v850_v34  ;;  %v878_v57 = vmul.u32 %v874_v1, %v851_v49  ;;  %v876_v31 = vmul.u32 %v874_v1, %v850_v34  ;;  %v879_v28 = vmul.u32 %v875_v56, %v851_v49 }
 0x721   :  { %v855_v59 = vmul.u32 %v853_v53, %v850_v34  ;;  %v856_v58 = vmul.u32 %v852_v51, %v851_v49  ;;  %v854_v10 = vmul.u32 %v852_v51, %v850_v34  ;;  %v857_v14 = vmul.u32 %v853_v53, %v851_v49 }
 0x722   :  { %v880_v15 = vshll.u32 %v877_v62, 16  ;;  %v882_v7 = vshll.u32 %v878_v57, 16  ;;  %v881_v6 = vshrl.u32 %v877_v62, 16  ;;  %v883_v26 = vshrl.u32 %v878_v57, 16 }
 0x723   :  { %v858_v13 = vshll.u32 %v855_v59, 16  ;;  %v860_v19 = vshll.u32 %v856_v58, 16  ;;  %v859_v41 = vshrl.u32 %v855_v59, 16  ;;  %v861_v24 = vshrl.u32 %v856_v58, 16 }
 0x724   :  { %vm884_vm1 = vc.u32 %v876_v31, %v880_v15  ;;  %v886_v27 = vadd.s32 %v880_v15, %v876_v31 }
 0x725   :  { %vm862_vm15 = vc.u32 %v854_v10, %v858_v13  ;;  %v864_v9 = vadd.s32 %v858_v13, %v854_v10  ;;  %v885_v40 = vsel %vm884_vm1, 1, %v1136_v5 }
 0x726   :  { %v863_v29 = vsel %vm862_vm15, 1, %v1136_v5  ;;  %v887_v44 = vadd.s32 %v885_v40, %v879_v28  ;;  %vm888_vm3 = vc.u32 %v886_v27, %v882_v7  ;;  %v890_v11 = vadd.s32 %v886_v27, %v882_v7 }
 0x727   :  { %v865_v38 = vadd.s32 %v863_v29, %v857_v14  ;;  %vm866_vm2 = vc.u32 %v864_v9, %v860_v19  ;;  %v889_v45 = vsel %vm888_vm3, 1, %v1136_v5  ;;  %vm1025_vm3 = vcmask 19472  }
 0x728   :  { %v867_v42 = vsel %vm866_vm2, 1, %v1136_v5  ;;  %v891_v20 = vadd.s32 %v889_v45, %v887_v44  ;;  %vm1017_vm2 = vcmask 3072  }
 0x729   :  { %v869_v43 = vadd.s32 %v867_v42, %v865_v38 }
 0x72a   :  { %v892_v32 = vadd.s32 %v891_v20, %v881_v6 }
 0x72b   :  { %v870_v50 = vadd.s32 %v869_v43, %v859_v41 }
 0x72c   :  { %v893_v46 = vadd.s32 %v892_v32, %v883_v26 }
 0x72d   :  { %v871_v36 = vadd.s32 %v870_v50, %v861_v24 }
 0x72e   :  { %v897_v5 = vadd.s32 1, %v893_v46 }
 0x72f   :  { %vm896_vm4 = vc.u32 %v871_v36, %v890_v11  ;;  %v895_v37 = vadd.s32 %v890_v11, %v871_v36 }
 0x730   :  { %v898_v55 = vsel %vm896_vm4, %v897_v5, %v893_v46 }
 0x731   :  { %v899_v34 = vadd.s32 %v898_v55, %v894_v30 }
 0x733   :  { %v900_v60 = vadd.s32 536870912, %v899_v34 }
 0x735   :  { %v901_v49 = vshrl.u32 %v900_v60, 30  ;;  %v767_v60 = vpop.xlane.xlu2 %766 }
 0x737   :  { %v902_v51 = vshll.u32 %v901_v49, 30  ;;  %v925_v27 = vsub.s32 4, %v901_v49 }
 0x739   :  { %v903_v16 = vsub.s32 %v899_v34, %v902_v51  ;;  %v926_v44 = vsel %vm803_vm7, %v925_v27, %v901_v49  ;;  %v761_v49 = vpop.xlane.xlu1 %760  ;;  %v768_v51 = vadd.f32 %v767_v60, %v1454_v39 }
 0x73a   :  { %v928_v43 = vsel %vm802_vm9, 0, %v926_v44 }
 0x73b   :  { %vm904_vm5 = vcmp.lt.s32.totalorder %v903_v16, 0  ;;  %v905_v53 = vsub.s32 0, %v903_v16  ;;  %v945_v22 = vadd.s32 3, %v928_v43 }
 0x73d   :  { %v906_v1 = vsel %vm904_vm5, %v905_v53, %v903_v16  ;;  %v946_v32 = vand.u32 3, %v945_v22  ;;  %v769_v53 = vadd.f32 %v768_v51, %v1355_v47 }
 0x73e   :  { %v907_v56 = vclz %v906_v1 }
 0x73f   :  { %vm948_vm10 = vcmp.eq.s32.totalorder %v946_v32, 0  ;;  %vm951_vm11 = vcmp.eq.s32.totalorder %v946_v32, 2  ;;  %vm947_vm0 = vcmp.lt.s32.totalorder %v946_v32, 2 }
 0x740   :  { %v1054_v59 = vadd.s32 4294967294, %v907_v56  ;;  %v777_v56 = vmul.f32 %v769_v53, %v769_v53 }
 0x742   :  { %vm1055_vm6 = vcmp.lt.s32.totalorder %v1054_v59, 0 }
 0x743   :  { %v910_v58 = vsel %vm1055_vm6, 0, %v1054_v59 }
 0x744   :  { %v911_v62 = vsub.s32 32, %v910_v58  ;;  %v915_v57 = vsub.s32 4294967266, %v910_v58  ;;  %v912_v10 = vshll.u32 %v903_v16, %v910_v58  ;;  %v762_v16 = vadd.f32 %v761_v49, %v1452_v33 }
 0x746   :  { %v913_v13 = vshrl.u32 %v895_v37, %v911_v62  ;;  %v916_v14 = vadd.s32 127, %v915_v57  ;;  %v763_v1 = vadd.f32 %v762_v16, %v1283_v35 }
 0x748   :  { %v914_v48 = vor.u32 %v913_v13, %v912_v10  ;;  %v917_v31 = vshll.u32 %v916_v14, 23  ;;  %v776_v59 = vmul.f32 %v763_v1, %v763_v1 }
 0x74a   :  { %v918_v15 = vor.u32 4788187, %v917_v31  ;;  %v921_v9 = vcvt.s32.f32 %v914_v48 }
 0x74c   :  { %v919_v19 = vand.u32 2147483647, %v918_v15 }
 0x74e   :  { %v922_v28 = vmul.f32 %v921_v9, %v919_v19 }
 0x750   :  { %v923_v29 = vxor.u32 2147483648, %v922_v28 }
 0x752   :  { %v924_v7 = vsel %vm803_vm7, %v923_v29, %v922_v28 }
 0x753   :  { %v927_v38 = vsel %vm802_vm9, %v1476_v52, %v924_v7  ;;  %v778_v52 = vadd.f32 %v777_v56, %v776_v59 }
 0x754   :  { %v929_v40 = vmul.f32 %v927_v38, %v927_v38 }
 0x755   :  { %v779_v58 = vmax.f32 %v778_v52, 1e-30  ;;  %vm790_vm1 = vcmp.gt.f32.partialorder %v778_v52, 0.0 }
 0x756   :  { %v930_v63 = vmul.f32 -0.001358992, %v929_v40  ;;  %v937_v42 = vmul.f32 -0.00019511016, %v929_v40 }
 0x757   :  { %1080 = vrsqrt.f32 %v779_v58  ;;  %vm786_vm14 = vweird.f32 %v779_v58 }
 0x758   :  { %v931_v2 = vadd.f32 0.041655596, %v930_v63  ;;  %v938_v41 = vadd.f32 0.008332121, %v937_v42 }
 0x75a   :  { %v932_v45 = vmul.f32 %v931_v2, %v929_v40  ;;  %v939_v6 = vmul.f32 %v938_v41, %v929_v40 }
 0x75c   :  { %v933_v20 = vadd.f32 -0.4999988, %v932_v45  ;;  %v940_v54 = vadd.f32 -0.16666654, %v939_v6 }
 0x75d   :  { %v1081_v37 = vpop.eup %1080 }
 0x75e   :  { %v934_v24 = vmul.f32 %v933_v20, %v929_v40  ;;  %v941_v50 = vmul.f32 %v940_v54, %v929_v40  ;;  %v781_v62 = vmul.f32 %v1081_v37, %v779_v58  ;;  %vm787_vm13 = vweird.f32 %v1081_v37 }
 0x75f   :  { %vm788_vm15 = vmor %vm786_vm14, %vm787_vm13 }
 0x760   :  { %v935_v26 = vadd.f32 1.0, %v934_v24  ;;  %v942_v17 = vadd.f32 1.0, %v941_v50  ;;  %v782_v57 = vmul.f32 %v1081_v37, %v781_v62 }
 0x762   :  { %v943_v36 = vmul.f32 %v942_v17, %v927_v38  ;;  %v952_v11 = vxor.u32 2147483648, %v935_v26  ;;  %v783_v10 = vmul.f32 0.5, %v782_v57 }
 0x764   :  { %v949_v18 = vxor.u32 2147483648, %v943_v36  ;;  %v953_v5 = vsel %vm951_vm11, %v952_v11, %v943_v36  ;;  %v784_v13 = vsub.f32 1.5, %v783_v10 }
 0x766   :  { %v950_v46 = vsel %vm948_vm10, %v935_v26, %v949_v18  ;;  %v785_v14 = vmul.f32 %v1081_v37, %v784_v13 }
 0x767   :  { %v954_v30 = vsel %vm947_vm0, %v950_v46, %v953_v5 }
 0x768   :  { %v955_v55 = vsel %vm944_vm12, nan, %v954_v30  ;;  %v789_v39 = vsel %vm788_vm15, %v1081_v37, %v785_v14 }
 0x769   :  { %v957_v34 = vrot.slane %v955_v55, 4  ;;  %962 = vrot.lane.b32.xlu1 %v955_v55, %s1143_s0  ;;  %v791_v33 = vmul.f32 %v789_v39, %v763_v1  ;;  %v793_v48 = vmul.f32 %v789_v39, %v769_v53 }
 0x76b   :  { %958 = vrot.lane.b32.xlu0 %v957_v34, %s1143_s0  ;;  %v792_v15 = vsel %vm790_vm1, %v791_v33, 1.0  ;;  %v794_v19 = vsel %vm790_vm1, %v793_v48, 0.0 }
 0x7db   :  { %v963_v31 = vpop.permute.xlu1 %962 }
 0x7dc   :  { %v965_v28 = vmul.f32 %v963_v31, %v794_v19  ;;  %v968_v29 = vmul.f32 %v963_v31, %v792_v15 }
 0x7dd   :  { %v959_v9 = vpop.permute.xlu0 %958 }
 0x7de   :  { %v961_v7 = vmul.f32 %v959_v9, %v792_v15  ;;  %v967_v27 = vmul.f32 %v959_v9, %v794_v19 }
 0x7e0   :  { %v966_v38 = vsub.f32 %v961_v7, %v965_v28  ;;  %v969_v40 = vadd.f32 %v968_v29, %v967_v27 }
 0x7e2   :  { %985 = vperm.xlu1 %1071, %v969_v40   ;;  %979 = vperm.xlu0 %1070, %v966_v38   ;;  %v970_v63 = vmul.f32 -1.0, %v969_v40 }
 0x7e4   :  { %v971_v42 = vmul.f32 0.1, %v970_v63 }
 0x7e6   :  { %973 = vrot.lane.b32.xlu2 %v971_v42, %s1145_s16 }
 0x7ea   :  { %1073 = vset.pattern.permute.xlu0 %v1146_v61 }
 0x840   :  { %v974_v44 = vpop.permute.xlu2 %973 }
 0x841   :  { %v976_v2 = vadd.f32 %v974_v44, %v1472_v8 }
 0x843   :  { %992 = vperm.xlu0 %1073, %v976_v2  }
 0x854   :  { %v980_v41 = vpop.permute.xlu0 %979  ;;  %v986_v43 = vpop.permute.xlu1 %985 }
 0x855   :  { %v988_v45 = vmul.f32 %v986_v43, %v1259_v3  ;;  %v982_v6 = vmul.f32 %v980_v41, %v1261_v4 }
 0x857   :  { %v989_v54 = vadd.f32 %v988_v45, %v982_v6 }
 0x8b5   :  { %v993_v20 = vpop.permute.xlu0 %992 }
 0x8b6   :  { %v995_v22 = vmul.f32 %v993_v20, %v1265_v12 }
 0x8b8   :  { %v996_v24 = vadd.f32 %v995_v22, %v989_v54 }
 0x8ba   :  { %v997_v50 = vadd.f32 %v996_v24, %v1267_v0 }
 0x8bc   :  { %v998_v26 = vmax.f32 %v997_v50, 0.0 }
 0x8be   :  { %v1011_v61 = vmul.f32 %v998_v26, %v1271_v21  ;;  %v1005_v17 = vmul.f32 %v998_v26, %v1273_v23  ;;  %v999_v8 = vmul.f32 %v998_v26, %v1275_v25 }
 0x8c0   :  { %v1012_v32 = vsel %vm272_vm8, %v1011_v61, 0.0  ;;  %v1006_v3 = vsel %vm272_vm8, %v1005_v17, 0.0  ;;  %v1000_v4 = vsel %vm272_vm8, %v999_v8, 0.0  ;;  %vm1023_vm8 = vcmask 11272  }
 0x8c1   :  { %1013 = vadd.xlane.f32.xlu0 %v1012_v32  ;;  %1007 = vadd.xlane.f32.xlu2 %v1006_v3 }
 0x8c2   :  { %1001 = vadd.xlane.f32.xlu1 %v1000_v4 }
 0x934   :  { %v1008_v12 = vpop.xlane.xlu2 %1007  ;;  %v1014_v23 = vpop.xlane.xlu0 %1013 }
 0x935   :  { %v1009_v36 = vadd.f32 %v1008_v12, %v969_v40  ;;  %v1002_v11 = vpop.xlane.xlu1 %1001  ;;  %v1015_v25 = vadd.f32 %v1014_v23, %v976_v2 }
 0x936   :  { %v1003_v0 = vadd.f32 %v1002_v11, %v966_v38 }
 0x937   :  { %v1010_v18 = vadd.f32 %v1009_v36, %v1355_v47  ;;  %v1016_v46 = vadd.f32 %v1015_v25, %v1283_v35 }
 0x938   :  { %v1004_v21 = vadd.f32 %v1003_v0, %v1283_v35 }
 0x939   :  { %1020 = vrot.lane.b32.xlu2 %v1010_v18, %s1144_s15 }
 0x93a   :  { %1018 = vst.msk [vmem:[#allocation5] sm:$0xf] %vm1017_vm2, %v1004_v21 }
 0x993   :  { %v1021_v5 = vpop.permute.xlu2 %1020 }
 0x994   :  { %1024 = vst.msk [vmem:[#allocation5] sm:$0xf] %vm1023_vm8, %v1021_v5 }
 0x995   :  { %1026 = vst.msk [vmem:[#allocation5] sm:$0xf] %vm1025_vm3, %v1016_v46 }
 0x996   :  { %1037 = dma.vmem_to_hbm [thread:$0]  %s1033_s19, 64, %s1035_s22, [#allocation4]  }
 0x997   :  { %1132 = dma.done.wait [#allocation4], 64  }
 0x998   :  { %1133 = vsyncadd [#allocation4], 4294967232 }
 0x999   :  { %1042 = vsyncpa [#allocation3], 1 }
 0x99a   :  { %1043 = vsyncpa [#allocation4], 1 }

</bundles_post_ra>
